<compile_context>
chip_gen: v6e
topology: v6e:2x2x1
jax: 0.10.0
libtpu: 0.0.40
codegen_flags: <defaults>
</compile_context>

<pallas_src>
import math

import jax
import jax.numpy as jnp
from jax import lax
from jax.experimental import pallas as pl
from jax.experimental.pallas import tpu as pltpu

# ---- small synthetic config (GPT-2 shrunk; critic keeps its 128 hidden) ----
B, T, D = 2, 8, 32
N_HEAD = 4
D_HEAD = D // N_HEAD
VOCAB = 128
N_LAYER = 2
MLP_H = 4 * D
CRITIC_H = 128
LN_EPS = 1e-5
NEG_INF = -1e9
BT = B * T
OUT_W = VOCAB + CRITIC_H        # fused lane-dense output: [logits | value slab]


def _num_batch_blocks():
    """One block of all rows on single-TC chips; one block per batch on v7x."""
    try:
        kind = jax.devices()[0].device_kind.lower()
    except Exception:
        return 1
    return B if ("v7" in kind or "7x" in kind) else 1


NB = _num_batch_blocks()        # grid size (parallel over TensorCores on v7x)
R = BT // NB                    # rows handled per grid step


def _layernorm(x, g, b):
    mu = jnp.mean(x, axis=-1, keepdims=True)
    xc = x - mu
    var = jnp.mean(xc * xc, axis=-1, keepdims=True)
    return xc * lax.rsqrt(var + LN_EPS) * g + b


def _bf16(x):
    return x.astype(jnp.bfloat16)


# ----------------------------- fused forward kernel --------------------------
def _fused_kernel(x_ref, bias_ref, vecs_ref, wqkv_ref, bqkv_ref, wproj_ref,
                  wfc_ref, bfc_ref, wout_ref, lnf_ref, wtail_ref, cvec_ref,
                  out_ref):
    x = x_ref[...]                      # (R, D) f32, VMEM-resident across layers
    bias = bias_ref[0]                  # (R, R) causal + key-padding additive bias
    rows = x.shape[0]
    scale = 1.0 / math.sqrt(D_HEAD)

    for l in range(N_LAYER):            # static layer loop, static weight indexing
        vec = vecs_ref[l]               # (6, D): ln1g ln1b bproj ln2g ln2b bout
        ln1g, ln1b = vec[0:1, :], vec[1:2, :]
        bproj = vec[2:3, :]
        ln2g, ln2b = vec[3:4, :], vec[4:5, :]
        bout = vec[5:6, :]

        # --- self attention: single fused QKV matmul (bf16 operands, f32 acc) ---
        h = _layernorm(x, ln1g, ln1b)
        qkv = jnp.dot(_bf16(h), wqkv_ref[l],
                      preferred_element_type=jnp.float32) + bqkv_ref[l]   # (R, 3D)

        # per-head scores, transpose-free (contract last dim of both operands)
        scores = []
        for hd in range(N_HEAD):
            q_h = qkv[:, hd * D_HEAD:(hd + 1) * D_HEAD]
            k_h = qkv[:, D + hd * D_HEAD:D + (hd + 1) * D_HEAD]
            s = lax.dot_general(_bf16(q_h), _bf16(k_h),
                                (((1,), (1,)), ((), ())),
                                preferred_element_type=jnp.float32)
            scores.append(s * scale + bias)

        # batched softmax: one max/exp/sum/reciprocal pass over all heads
        s_all = jnp.concatenate(scores, axis=0)              # (N_HEAD*R, R)
        s_all = s_all - jnp.max(s_all, axis=-1, keepdims=True)
        p_all = jnp.exp(s_all)
        p_all = p_all * pl.reciprocal(jnp.sum(p_all, axis=-1, keepdims=True),
                                      approx=True)

        ctxs = []
        for hd in range(N_HEAD):
            p_h = p_all[hd * rows:(hd + 1) * rows, :]
            v_h = qkv[:, 2 * D + hd * D_HEAD:2 * D + (hd + 1) * D_HEAD]
            ctxs.append(jnp.dot(_bf16(p_h), _bf16(v_h),
                                preferred_element_type=jnp.float32))
        ctx = jnp.concatenate(ctxs, axis=-1)                  # (R, D)
        x = x + jnp.dot(_bf16(ctx), wproj_ref[l],
                        preferred_element_type=jnp.float32) + bproj

        # --- MLP ---
        h2 = _layernorm(x, ln2g, ln2b)
        fc = jnp.dot(_bf16(h2), wfc_ref[l],
                     preferred_element_type=jnp.float32) + bfc_ref[l]
        act = jax.nn.gelu(fc, approximate=True)               # gelu_new (tanh)
        x = x + jnp.dot(_bf16(act), wout_ref[l],
                        preferred_element_type=jnp.float32) + bout

    # --- final LN, then ONE fused tail matmul: [tied LM head | critic fc1] ---
    lnf = lnf_ref[...]                                        # (2, D): gain, bias
    hf = _layernorm(x, lnf[0:1, :], lnf[1:2, :])
    y = jnp.dot(_bf16(hf), wtail_ref[...],
                preferred_element_type=jnp.float32)           # (R, VOCAB+CRITIC_H)

    out_ref[:, :VOCAB] = y[:, :VOCAB]                         # logits (128-lane aligned)

    # critic: + cb1 -> LeakyReLU(0.01) -> VPU multiply + row reduce (cw2^T) + cb2
    c = y[:, VOCAB:] + cvec_ref[0:1, :]
    c = jnp.where(c > 0, c, 0.01 * c)
    val = jnp.sum(c * cvec_ref[1:2, :], axis=-1, keepdims=True) + cvec_ref[2:3, 0:1]
    out_ref[:, VOCAB:] = jnp.broadcast_to(val, (rows, CRITIC_H))   # lane-dense store


# ------------------------------- wrapper -------------------------------------
def _vmem_full():
    # whole-array, VMEM-resident weight spec (DMA'd once, not per grid step)
    return pl.BlockSpec(memory_space=pltpu.MemorySpace.VMEM)


def _fused_forward(x2d, bias, packed):
    grid_spec = pltpu.PrefetchScalarGridSpec(
        num_scalar_prefetch=0,
        grid=(NB,),
        in_specs=[
            pl.BlockSpec((R, D), lambda i: (i, 0)),           # activations
            pl.BlockSpec((1, R, R), lambda i: (i, 0, 0)),     # per-block attn bias
            _vmem_full(),   # vecs
            _vmem_full(),   # wqkv
            _vmem_full(),   # bqkv
            _vmem_full(),   # wproj
            _vmem_full(),   # wfc
            _vmem_full(),   # bfc
            _vmem_full(),   # wout
            _vmem_full(),   # lnf
            _vmem_full(),   # wtail
            _vmem_full(),   # cvec
        ],
        out_specs=pl.BlockSpec((R, OUT_W), lambda i: (i, 0)),
    )
    return pl.pallas_call(
        _fused_kernel,
        out_shape=jax.ShapeDtypeStruct((BT, OUT_W), jnp.float32),
        grid_spec=grid_spec,
        compiler_params=pltpu.CompilerParams(
            dimension_semantics=("parallel",)),
    )(x2d, bias, packed["vecs"], packed["wqkv"], packed["bqkv"], packed["wproj"],
      packed["wfc"], packed["bfc"], packed["wout"], packed["lnf"],
      packed["wtail"], packed["cvec"])


def pack_params(params):
    """One-time packing: stack per-layer weights, cast matmul weights to bf16."""
    blocks = params["blocks"]
    f32, bf16 = jnp.float32, jnp.bfloat16

    def st(fn, dt):
        return jnp.stack([fn(b) for b in blocks]).astype(dt)

    vecs = st(lambda b: jnp.concatenate(
        [b["ln1g"], b["ln1b"], b["bproj"], b["ln2g"], b["ln2b"], b["bout"]],
        axis=0), f32)                                          # (L, 6, D)
    return {
        "wte": params["wte"].astype(f32),                      # embedding gather
        "wpe": params["wpe"].astype(f32),
        "vecs": vecs,                                          # (L, 6, D)
        "wqkv": st(lambda b: b["wqkv"], bf16),                 # (L, D, 3D)
        "bqkv": st(lambda b: b["bqkv"], f32),                  # (L, 1, 3D)
        "wproj": st(lambda b: b["wproj"], bf16),               # (L, D, D)
        "wfc": st(lambda b: b["wfc"], bf16),                   # (L, D, MLP_H)
        "bfc": st(lambda b: b["bfc"], f32),                    # (L, 1, MLP_H)
        "wout": st(lambda b: b["wout"], bf16),                 # (L, MLP_H, D)
        "lnf": jnp.concatenate([params["lnfg"], params["lnfb"]],
                               axis=0).astype(f32),            # (2, D)
        # tied LM head (wte.T) fused with critic fc1 -> one (D, 256) tail matmul
        "wtail": jnp.concatenate([params["wte"].T, params["cw1"]],
                                 axis=1).astype(bf16),         # (D, VOCAB+CRITIC_H)
        "cvec": jnp.concatenate(
            [params["cb1"], params["cw2"].T,
             jnp.broadcast_to(params["cb2"], (1, CRITIC_H))],
            axis=0).astype(f32),                               # (3, CRITIC_H)
    }


def _attention_bias(masks):
    """(NB, R, R) additive bias: causal + key padding (+ block-diag when NB=1)."""
    keep = masks > 0                                           # (B, T)
    if NB == 1:
        row = jnp.arange(BT)
        col = jnp.arange(BT)
        same = (row[:, None] // T) == (col[None, :] // T)
        causal = (col[None, :] % T) <= (row[:, None] % T)
        allow = same & causal & keep.reshape(BT)[None, :]
        return jnp.where(allow, 0.0, NEG_INF).astype(jnp.float32)[None]
    row = jnp.arange(T)
    col = jnp.arange(T)
    causal = col[None, :] <= row[:, None]                      # (T, T)
    allow = causal[None, :, :] & keep[:, None, :]              # (B, T, T)
    return jnp.where(allow, 0.0, NEG_INF).astype(jnp.float32)


# ---------------------------- parameter init ---------------------------------
def init_params(key):
    keys = iter(jax.random.split(key, 64))

    def nrm(shape, scale=0.02):
        return (scale * jax.random.normal(next(keys), shape)).astype(jnp.float32)

    params = {
        "wte": nrm((VOCAB, D)),
        "wpe": nrm((T, D)),
        "lnfg": jnp.ones((1, D), jnp.float32),
        "lnfb": jnp.zeros((1, D), jnp.float32),
        "cw1": nrm((D, CRITIC_H), 0.1),
        "cb1": jnp.zeros((1, CRITIC_H), jnp.float32),
        "cw2": nrm((CRITIC_H, 1), 0.1),
        "cb2": jnp.zeros((1, 1), jnp.float32),
        "blocks": [],
    }
    for _ in range(N_LAYER):
        params["blocks"].append({
            "ln1g": jnp.ones((1, D), jnp.float32),
            "ln1b": jnp.zeros((1, D), jnp.float32),
            "wqkv": nrm((D, 3 * D)),
            "bqkv": jnp.zeros((1, 3 * D), jnp.float32),
            "wproj": nrm((D, D)),
            "bproj": jnp.zeros((1, D), jnp.float32),
            "ln2g": jnp.ones((1, D), jnp.float32),
            "ln2b": jnp.zeros((1, D), jnp.float32),
            "wfc": nrm((D, MLP_H)),
            "bfc": jnp.zeros((1, MLP_H), jnp.float32),
            "wout": nrm((MLP_H, D)),
            "bout": jnp.zeros((1, D), jnp.float32),
        })
    return params


# ------------------------------ forward pass ---------------------------------
@jax.jit
def gptactor_forward(packed, ids, masks):
    """Jitted forward: embedding gather + fused Pallas transformer/LM-head/critic."""
    x = packed["wte"][ids] + packed["wpe"][None, :, :]         # (B, T, D)
    x2d = x.reshape(BT, D).astype(jnp.float32)
    bias = _attention_bias(masks)

    y = _fused_forward(x2d, bias, packed)                      # (BT, VOCAB+CRITIC_H)
    logits = y[:, :VOCAB].reshape(B, T, VOCAB)
    value = y[:, VOCAB:VOCAB + 1].reshape(B, T, 1)
    # TODO(synk): labels/cross-entropy loss path (target is not None) not exercised.
    return logits, value


if __name__ == "__main__":
    key = jax.random.PRNGKey(0)
    pkey, ikey = jax.random.split(key)
    params = init_params(pkey)
    packed = pack_params(params)                               # hoisted: packed ONCE

    ids = jax.random.randint(ikey, (B, T), 0, VOCAB, dtype=jnp.int32)
    masks = jnp.ones((B, T), jnp.int32).at[1, T - 2:].set(0)   # pad last 2 of batch 1

    logits, value = gptactor_forward(packed, ids, masks)
    jax.block_until_ready((logits, value))
    # second call exercises the cached jit path (no re-packing, no eager glue)
    logits, value = gptactor_forward(packed, ids, masks)
    jax.block_until_ready((logits, value))

    assert logits.shape == (B, T, VOCAB) and logits.dtype == jnp.float32
    assert value.shape == (B, T, 1) and value.dtype == jnp.float32
    assert bool(jnp.all(jnp.isfinite(logits))) and bool(jnp.all(jnp.isfinite(value)))
    print("KERNEL_OK")
</pallas_src>

<mosaic_0001>
module attributes {stable_mosaic.version = 11 : i64} {
  func.func @_fused_kernel(%arg0: i32, %arg1: memref<16x32xf32, #tpu.memory_space<vmem>>, %arg2: memref<1x16x16xf32, #tpu.memory_space<vmem>>, %arg3: memref<2x6x32xf32, #tpu.memory_space<vmem>>, %arg4: memref<2x32x96xbf16, #tpu.memory_space<vmem>>, %arg5: memref<2x1x96xf32, #tpu.memory_space<vmem>>, %arg6: memref<2x32x32xbf16, #tpu.memory_space<vmem>>, %arg7: memref<2x32x128xbf16, #tpu.memory_space<vmem>>, %arg8: memref<2x1x128xf32, #tpu.memory_space<vmem>>, %arg9: memref<2x128x32xbf16, #tpu.memory_space<vmem>>, %arg10: memref<2x32xf32, #tpu.memory_space<vmem>>, %arg11: memref<32x256xbf16, #tpu.memory_space<vmem>>, %arg12: memref<3x128xf32, #tpu.memory_space<vmem>>, %arg13: memref<16x256xf32, #tpu.memory_space<vmem>>) attributes {dimension_semantics = [#tpu.dimension_semantics<parallel>], iteration_bounds = array<i64: 1>, scalar_prefetch = 0 : i64, scratch_operands = 0 : i64, tpu.core_type = #tpu.core_type<tc>, window_params = [{transform_indices = @transform_0, window_bounds = array<i64: 16, 32>}, {transform_indices = @transform_1, window_bounds = array<i64: 1, 16, 16>}, {pipeline_mode = #tpu.pipeline_mode<synchronous>, transform_indices = @transform_2, window_bounds = array<i64: 2, 6, 32>}, {pipeline_mode = #tpu.pipeline_mode<synchronous>, transform_indices = @transform_3, window_bounds = array<i64: 2, 32, 96>}, {pipeline_mode = #tpu.pipeline_mode<synchronous>, transform_indices = @transform_4, window_bounds = array<i64: 2, 1, 96>}, {pipeline_mode = #tpu.pipeline_mode<synchronous>, transform_indices = @transform_5, window_bounds = array<i64: 2, 32, 32>}, {pipeline_mode = #tpu.pipeline_mode<synchronous>, transform_indices = @transform_6, window_bounds = array<i64: 2, 32, 128>}, {pipeline_mode = #tpu.pipeline_mode<synchronous>, transform_indices = @transform_7, window_bounds = array<i64: 2, 1, 128>}, {pipeline_mode = #tpu.pipeline_mode<synchronous>, transform_indices = @transform_8, window_bounds = array<i64: 2, 128, 32>}, {pipeline_mode = #tpu.pipeline_mode<synchronous>, transform_indices = @transform_9, window_bounds = array<i64: 2, 32>}, {pipeline_mode = #tpu.pipeline_mode<synchronous>, transform_indices = @transform_10, window_bounds = array<i64: 32, 256>}, {pipeline_mode = #tpu.pipeline_mode<synchronous>, transform_indices = @transform_11, window_bounds = array<i64: 3, 128>}, {transform_indices = @transform_12, window_bounds = array<i64: 16, 256>}]} {
    %c0 = arith.constant 0 : index
    %c0_0 = arith.constant 0 : index
    %0 = vector.load %arg1[%c0, %c0_0] : memref<16x32xf32, #tpu.memory_space<vmem>>, vector<16x32xf32>
    %c0_1 = arith.constant 0 : index
    %c0_2 = arith.constant 0 : index
    %c0_3 = arith.constant 0 : index
    %1 = vector.load %arg2[%c0_1, %c0_2, %c0_3] : memref<1x16x16xf32, #tpu.memory_space<vmem>>, vector<1x16x16xf32>
    %2 = vector.shape_cast %1 : vector<1x16x16xf32> to vector<16x16xf32>
    %c0_4 = arith.constant 0 : index
    %c0_5 = arith.constant 0 : index
    %c0_6 = arith.constant 0 : index
    %3 = vector.load %arg3[%c0_4, %c0_5, %c0_6] : memref<2x6x32xf32, #tpu.memory_space<vmem>>, vector<1x6x32xf32>
    %4 = vector.shape_cast %3 : vector<1x6x32xf32> to vector<6x32xf32>
    %5 = vector.extract_strided_slice %4 {offsets = [0, 0], sizes = [1, 32], strides = [1, 1]} : vector<6x32xf32> to vector<1x32xf32>
    %6 = vector.extract_strided_slice %4 {offsets = [1, 0], sizes = [1, 32], strides = [1, 1]} : vector<6x32xf32> to vector<1x32xf32>
    %7 = vector.extract_strided_slice %4 {offsets = [2, 0], sizes = [1, 32], strides = [1, 1]} : vector<6x32xf32> to vector<1x32xf32>
    %8 = vector.extract_strided_slice %4 {offsets = [3, 0], sizes = [1, 32], strides = [1, 1]} : vector<6x32xf32> to vector<1x32xf32>
    %9 = vector.extract_strided_slice %4 {offsets = [4, 0], sizes = [1, 32], strides = [1, 1]} : vector<6x32xf32> to vector<1x32xf32>
    %10 = vector.extract_strided_slice %4 {offsets = [5, 0], sizes = [1, 32], strides = [1, 1]} : vector<6x32xf32> to vector<1x32xf32>
    %cst = arith.constant dense<0.000000e+00> : vector<16xf32>
    %11 = vector.multi_reduction <add>, %0, %cst [1] : vector<16x32xf32> to vector<16xf32>
    %12 = vector.shape_cast %11 : vector<16xf32> to vector<16x1xf32>
    %cst_7 = arith.constant 3.200000e+01 : f32
    %13 = vector.broadcast %cst_7 : f32 to vector<16x1xf32>
    %14 = arith.divf %12, %13 : vector<16x1xf32>
    %15 = vector.broadcast %14 : vector<16x1xf32> to vector<16x32xf32>
    %16 = arith.subf %0, %15 : vector<16x32xf32>
    %17 = arith.mulf %16, %16 : vector<16x32xf32>
    %cst_8 = arith.constant dense<0.000000e+00> : vector<16xf32>
    %18 = vector.multi_reduction <add>, %17, %cst_8 [1] : vector<16x32xf32> to vector<16xf32>
    %19 = vector.shape_cast %18 : vector<16xf32> to vector<16x1xf32>
    %cst_9 = arith.constant 3.200000e+01 : f32
    %20 = vector.broadcast %cst_9 : f32 to vector<16x1xf32>
    %21 = arith.divf %19, %20 : vector<16x1xf32>
    %cst_10 = arith.constant 9.99999974E-6 : f32
    %22 = vector.broadcast %cst_10 : f32 to vector<16x1xf32>
    %23 = arith.addf %21, %22 : vector<16x1xf32>
    %24 = math.rsqrt %23 : vector<16x1xf32>
    %25 = vector.broadcast %24 : vector<16x1xf32> to vector<16x32xf32>
    %26 = arith.mulf %16, %25 : vector<16x32xf32>
    %27 = vector.broadcast %5 : vector<1x32xf32> to vector<16x32xf32>
    %28 = arith.mulf %26, %27 : vector<16x32xf32>
    %29 = vector.broadcast %6 : vector<1x32xf32> to vector<16x32xf32>
    %30 = arith.addf %28, %29 : vector<16x32xf32>
    %31 = arith.truncf %30 : vector<16x32xf32> to vector<16x32xbf16>
    %c0_11 = arith.constant 0 : index
    %c0_12 = arith.constant 0 : index
    %c0_13 = arith.constant 0 : index
    %32 = vector.load %arg4[%c0_11, %c0_12, %c0_13] : memref<2x32x96xbf16, #tpu.memory_space<vmem>>, vector<1x32x96xbf16>
    %33 = vector.shape_cast %32 : vector<1x32x96xbf16> to vector<32x96xbf16>
    %cst_14 = arith.constant dense<0.000000e+00> : vector<16x96xf32>
    %34 = tpu.matmul %31, %33, %cst_14 {dimension_numbers = #tpu.dot_dimension_numbers<[1], [0], [0], [1], [0, 0, 1, 1], [], []>} : vector<16x32xbf16>, vector<32x96xbf16>, vector<16x96xf32> -> vector<16x96xf32>
    %c0_15 = arith.constant 0 : index
    %c0_16 = arith.constant 0 : index
    %c0_17 = arith.constant 0 : index
    %35 = vector.load %arg5[%c0_15, %c0_16, %c0_17] : memref<2x1x96xf32, #tpu.memory_space<vmem>>, vector<1x1x96xf32>
    %36 = vector.shape_cast %35 : vector<1x1x96xf32> to vector<1x96xf32>
    %37 = vector.broadcast %36 : vector<1x96xf32> to vector<16x96xf32>
    %38 = arith.addf %34, %37 : vector<16x96xf32>
    %39 = vector.extract_strided_slice %38 {offsets = [0, 0], sizes = [16, 8], strides = [1, 1]} : vector<16x96xf32> to vector<16x8xf32>
    %40 = vector.extract_strided_slice %38 {offsets = [0, 32], sizes = [16, 8], strides = [1, 1]} : vector<16x96xf32> to vector<16x8xf32>
    %41 = arith.truncf %39 : vector<16x8xf32> to vector<16x8xbf16>
    %42 = arith.truncf %40 : vector<16x8xf32> to vector<16x8xbf16>
    %cst_18 = arith.constant dense<0.000000e+00> : vector<16x16xf32>
    %43 = tpu.matmul %41, %42, %cst_18 {dimension_numbers = #tpu.dot_dimension_numbers<[1], [1], [0], [0], [0, 0, 1, 0], [], []>} : vector<16x8xbf16>, vector<16x8xbf16>, vector<16x16xf32> -> vector<16x16xf32>
    %cst_19 = arith.constant 0.353553385 : f32
    %44 = vector.broadcast %cst_19 : f32 to vector<16x16xf32>
    %45 = arith.mulf %43, %44 : vector<16x16xf32>
    %46 = arith.addf %45, %2 : vector<16x16xf32>
    %47 = vector.extract_strided_slice %38 {offsets = [0, 8], sizes = [16, 8], strides = [1, 1]} : vector<16x96xf32> to vector<16x8xf32>
    %48 = vector.extract_strided_slice %38 {offsets = [0, 40], sizes = [16, 8], strides = [1, 1]} : vector<16x96xf32> to vector<16x8xf32>
    %49 = arith.truncf %47 : vector<16x8xf32> to vector<16x8xbf16>
    %50 = arith.truncf %48 : vector<16x8xf32> to vector<16x8xbf16>
    %cst_20 = arith.constant dense<0.000000e+00> : vector<16x16xf32>
    %51 = tpu.matmul %49, %50, %cst_20 {dimension_numbers = #tpu.dot_dimension_numbers<[1], [1], [0], [0], [0, 0, 1, 0], [], []>} : vector<16x8xbf16>, vector<16x8xbf16>, vector<16x16xf32> -> vector<16x16xf32>
    %cst_21 = arith.constant 0.353553385 : f32
    %52 = vector.broadcast %cst_21 : f32 to vector<16x16xf32>
    %53 = arith.mulf %51, %52 : vector<16x16xf32>
    %54 = arith.addf %53, %2 : vector<16x16xf32>
    %55 = vector.extract_strided_slice %38 {offsets = [0, 16], sizes = [16, 8], strides = [1, 1]} : vector<16x96xf32> to vector<16x8xf32>
    %56 = vector.extract_strided_slice %38 {offsets = [0, 48], sizes = [16, 8], strides = [1, 1]} : vector<16x96xf32> to vector<16x8xf32>
    %57 = arith.truncf %55 : vector<16x8xf32> to vector<16x8xbf16>
    %58 = arith.truncf %56 : vector<16x8xf32> to vector<16x8xbf16>
    %cst_22 = arith.constant dense<0.000000e+00> : vector<16x16xf32>
    %59 = tpu.matmul %57, %58, %cst_22 {dimension_numbers = #tpu.dot_dimension_numbers<[1], [1], [0], [0], [0, 0, 1, 0], [], []>} : vector<16x8xbf16>, vector<16x8xbf16>, vector<16x16xf32> -> vector<16x16xf32>
    %cst_23 = arith.constant 0.353553385 : f32
    %60 = vector.broadcast %cst_23 : f32 to vector<16x16xf32>
    %61 = arith.mulf %59, %60 : vector<16x16xf32>
    %62 = arith.addf %61, %2 : vector<16x16xf32>
    %63 = vector.extract_strided_slice %38 {offsets = [0, 24], sizes = [16, 8], strides = [1, 1]} : vector<16x96xf32> to vector<16x8xf32>
    %64 = vector.extract_strided_slice %38 {offsets = [0, 56], sizes = [16, 8], strides = [1, 1]} : vector<16x96xf32> to vector<16x8xf32>
    %65 = arith.truncf %63 : vector<16x8xf32> to vector<16x8xbf16>
    %66 = arith.truncf %64 : vector<16x8xf32> to vector<16x8xbf16>
    %cst_24 = arith.constant dense<0.000000e+00> : vector<16x16xf32>
    %67 = tpu.matmul %65, %66, %cst_24 {dimension_numbers = #tpu.dot_dimension_numbers<[1], [1], [0], [0], [0, 0, 1, 0], [], []>} : vector<16x8xbf16>, vector<16x8xbf16>, vector<16x16xf32> -> vector<16x16xf32>
    %cst_25 = arith.constant 0.353553385 : f32
    %68 = vector.broadcast %cst_25 : f32 to vector<16x16xf32>
    %69 = arith.mulf %67, %68 : vector<16x16xf32>
    %70 = arith.addf %69, %2 : vector<16x16xf32>
    %71 = tpu.concatenate %46, %54, %62, %70 in 0 : vector<16x16xf32>, vector<16x16xf32>, vector<16x16xf32>, vector<16x16xf32> -> vector<64x16xf32>
    %cst_26 = arith.constant dense<0xFF800000> : vector<64xf32>
    %72 = vector.multi_reduction <maximumf>, %71, %cst_26 [1] : vector<64x16xf32> to vector<64xf32>
    %73 = vector.shape_cast %72 : vector<64xf32> to vector<64x1xf32>
    %74 = vector.broadcast %73 : vector<64x1xf32> to vector<64x16xf32>
    %75 = arith.subf %71, %74 : vector<64x16xf32>
    %76 = math.exp %75 : vector<64x16xf32>
    %cst_27 = arith.constant dense<0.000000e+00> : vector<64xf32>
    %77 = vector.multi_reduction <add>, %76, %cst_27 [1] : vector<64x16xf32> to vector<64xf32>
    %78 = vector.shape_cast %77 : vector<64xf32> to vector<64x1xf32>
    %79 = tpu.reciprocal %78 {approx = true} : vector<64x1xf32> -> vector<64x1xf32>
    %80 = vector.broadcast %79 : vector<64x1xf32> to vector<64x16xf32>
    %81 = arith.mulf %76, %80 : vector<64x16xf32>
    %82 = vector.extract_strided_slice %81 {offsets = [0, 0], sizes = [16, 16], strides = [1, 1]} : vector<64x16xf32> to vector<16x16xf32>
    %83 = vector.extract_strided_slice %38 {offsets = [0, 64], sizes = [16, 8], strides = [1, 1]} : vector<16x96xf32> to vector<16x8xf32>
    %84 = arith.truncf %82 : vector<16x16xf32> to vector<16x16xbf16>
    %85 = arith.truncf %83 : vector<16x8xf32> to vector<16x8xbf16>
    %cst_28 = arith.constant dense<0.000000e+00> : vector<16x8xf32>
    %86 = tpu.matmul %84, %85, %cst_28 {dimension_numbers = #tpu.dot_dimension_numbers<[1], [0], [0], [1], [0, 0, 1, 1], [], []>} : vector<16x16xbf16>, vector<16x8xbf16>, vector<16x8xf32> -> vector<16x8xf32>
    %87 = vector.extract_strided_slice %81 {offsets = [16, 0], sizes = [16, 16], strides = [1, 1]} : vector<64x16xf32> to vector<16x16xf32>
    %88 = vector.extract_strided_slice %38 {offsets = [0, 72], sizes = [16, 8], strides = [1, 1]} : vector<16x96xf32> to vector<16x8xf32>
    %89 = arith.truncf %87 : vector<16x16xf32> to vector<16x16xbf16>
    %90 = arith.truncf %88 : vector<16x8xf32> to vector<16x8xbf16>
    %cst_29 = arith.constant dense<0.000000e+00> : vector<16x8xf32>
    %91 = tpu.matmul %89, %90, %cst_29 {dimension_numbers = #tpu.dot_dimension_numbers<[1], [0], [0], [1], [0, 0, 1, 1], [], []>} : vector<16x16xbf16>, vector<16x8xbf16>, vector<16x8xf32> -> vector<16x8xf32>
    %92 = vector.extract_strided_slice %81 {offsets = [32, 0], sizes = [16, 16], strides = [1, 1]} : vector<64x16xf32> to vector<16x16xf32>
    %93 = vector.extract_strided_slice %38 {offsets = [0, 80], sizes = [16, 8], strides = [1, 1]} : vector<16x96xf32> to vector<16x8xf32>
    %94 = arith.truncf %92 : vector<16x16xf32> to vector<16x16xbf16>
    %95 = arith.truncf %93 : vector<16x8xf32> to vector<16x8xbf16>
    %cst_30 = arith.constant dense<0.000000e+00> : vector<16x8xf32>
    %96 = tpu.matmul %94, %95, %cst_30 {dimension_numbers = #tpu.dot_dimension_numbers<[1], [0], [0], [1], [0, 0, 1, 1], [], []>} : vector<16x16xbf16>, vector<16x8xbf16>, vector<16x8xf32> -> vector<16x8xf32>
    %97 = vector.extract_strided_slice %81 {offsets = [48, 0], sizes = [16, 16], strides = [1, 1]} : vector<64x16xf32> to vector<16x16xf32>
    %98 = vector.extract_strided_slice %38 {offsets = [0, 88], sizes = [16, 8], strides = [1, 1]} : vector<16x96xf32> to vector<16x8xf32>
    %99 = arith.truncf %97 : vector<16x16xf32> to vector<16x16xbf16>
    %100 = arith.truncf %98 : vector<16x8xf32> to vector<16x8xbf16>
    %cst_31 = arith.constant dense<0.000000e+00> : vector<16x8xf32>
    %101 = tpu.matmul %99, %100, %cst_31 {dimension_numbers = #tpu.dot_dimension_numbers<[1], [0], [0], [1], [0, 0, 1, 1], [], []>} : vector<16x16xbf16>, vector<16x8xbf16>, vector<16x8xf32> -> vector<16x8xf32>
    %102 = tpu.concatenate %86, %91, %96, %101 in 1 : vector<16x8xf32>, vector<16x8xf32>, vector<16x8xf32>, vector<16x8xf32> -> vector<16x32xf32>
    %103 = arith.truncf %102 : vector<16x32xf32> to vector<16x32xbf16>
    %c0_32 = arith.constant 0 : index
    %c0_33 = arith.constant 0 : index
    %c0_34 = arith.constant 0 : index
    %104 = vector.load %arg6[%c0_32, %c0_33, %c0_34] : memref<2x32x32xbf16, #tpu.memory_space<vmem>>, vector<1x32x32xbf16>
    %105 = vector.shape_cast %104 : vector<1x32x32xbf16> to vector<32x32xbf16>
    %cst_35 = arith.constant dense<0.000000e+00> : vector<16x32xf32>
    %106 = tpu.matmul %103, %105, %cst_35 {dimension_numbers = #tpu.dot_dimension_numbers<[1], [0], [0], [1], [0, 0, 1, 1], [], []>} : vector<16x32xbf16>, vector<32x32xbf16>, vector<16x32xf32> -> vector<16x32xf32>
    %107 = arith.addf %0, %106 : vector<16x32xf32>
    %108 = vector.broadcast %7 : vector<1x32xf32> to vector<16x32xf32>
    %109 = arith.addf %107, %108 : vector<16x32xf32>
    %cst_36 = arith.constant dense<0.000000e+00> : vector<16xf32>
    %110 = vector.multi_reduction <add>, %109, %cst_36 [1] : vector<16x32xf32> to vector<16xf32>
    %111 = vector.shape_cast %110 : vector<16xf32> to vector<16x1xf32>
    %cst_37 = arith.constant 3.200000e+01 : f32
    %112 = vector.broadcast %cst_37 : f32 to vector<16x1xf32>
    %113 = arith.divf %111, %112 : vector<16x1xf32>
    %114 = vector.broadcast %113 : vector<16x1xf32> to vector<16x32xf32>
    %115 = arith.subf %109, %114 : vector<16x32xf32>
    %116 = arith.mulf %115, %115 : vector<16x32xf32>
    %cst_38 = arith.constant dense<0.000000e+00> : vector<16xf32>
    %117 = vector.multi_reduction <add>, %116, %cst_38 [1] : vector<16x32xf32> to vector<16xf32>
    %118 = vector.shape_cast %117 : vector<16xf32> to vector<16x1xf32>
    %cst_39 = arith.constant 3.200000e+01 : f32
    %119 = vector.broadcast %cst_39 : f32 to vector<16x1xf32>
    %120 = arith.divf %118, %119 : vector<16x1xf32>
    %cst_40 = arith.constant 9.99999974E-6 : f32
    %121 = vector.broadcast %cst_40 : f32 to vector<16x1xf32>
    %122 = arith.addf %120, %121 : vector<16x1xf32>
    %123 = math.rsqrt %122 : vector<16x1xf32>
    %124 = vector.broadcast %123 : vector<16x1xf32> to vector<16x32xf32>
    %125 = arith.mulf %115, %124 : vector<16x32xf32>
    %126 = vector.broadcast %8 : vector<1x32xf32> to vector<16x32xf32>
    %127 = arith.mulf %125, %126 : vector<16x32xf32>
    %128 = vector.broadcast %9 : vector<1x32xf32> to vector<16x32xf32>
    %129 = arith.addf %127, %128 : vector<16x32xf32>
    %130 = arith.truncf %129 : vector<16x32xf32> to vector<16x32xbf16>
    %c0_41 = arith.constant 0 : index
    %c0_42 = arith.constant 0 : index
    %c0_43 = arith.constant 0 : index
    %131 = vector.load %arg7[%c0_41, %c0_42, %c0_43] : memref<2x32x128xbf16, #tpu.memory_space<vmem>>, vector<1x32x128xbf16>
    %132 = vector.shape_cast %131 : vector<1x32x128xbf16> to vector<32x128xbf16>
    %cst_44 = arith.constant dense<0.000000e+00> : vector<16x128xf32>
    %133 = tpu.matmul %130, %132, %cst_44 {dimension_numbers = #tpu.dot_dimension_numbers<[1], [0], [0], [1], [0, 0, 1, 1], [], []>} : vector<16x32xbf16>, vector<32x128xbf16>, vector<16x128xf32> -> vector<16x128xf32>
    %c0_45 = arith.constant 0 : index
    %c0_46 = arith.constant 0 : index
    %c0_47 = arith.constant 0 : index
    %134 = vector.load %arg8[%c0_45, %c0_46, %c0_47] : memref<2x1x128xf32, #tpu.memory_space<vmem>>, vector<1x1x128xf32>
    %135 = vector.shape_cast %134 : vector<1x1x128xf32> to vector<1x128xf32>
    %136 = vector.broadcast %135 : vector<1x128xf32> to vector<16x128xf32>
    %137 = arith.addf %133, %136 : vector<16x128xf32>
    %138 = arith.mulf %137, %137 : vector<16x128xf32>
    %139 = arith.mulf %137, %138 : vector<16x128xf32>
    %cst_48 = arith.constant 4.471500e-02 : f32
    %140 = vector.broadcast %cst_48 : f32 to vector<16x128xf32>
    %141 = arith.mulf %140, %139 : vector<16x128xf32>
    %142 = arith.addf %137, %141 : vector<16x128xf32>
    %cst_49 = arith.constant 0.797884583 : f32
    %143 = vector.broadcast %cst_49 : f32 to vector<16x128xf32>
    %144 = arith.mulf %143, %142 : vector<16x128xf32>
    %145 = math.tanh %144 : vector<16x128xf32>
    %cst_50 = arith.constant 1.000000e+00 : f32
    %146 = vector.broadcast %cst_50 : f32 to vector<16x128xf32>
    %147 = arith.addf %146, %145 : vector<16x128xf32>
    %cst_51 = arith.constant 5.000000e-01 : f32
    %148 = vector.broadcast %cst_51 : f32 to vector<16x128xf32>
    %149 = arith.mulf %148, %147 : vector<16x128xf32>
    %150 = arith.mulf %137, %149 : vector<16x128xf32>
    %151 = arith.truncf %150 : vector<16x128xf32> to vector<16x128xbf16>
    %c0_52 = arith.constant 0 : index
    %c0_53 = arith.constant 0 : index
    %c0_54 = arith.constant 0 : index
    %152 = vector.load %arg9[%c0_52, %c0_53, %c0_54] : memref<2x128x32xbf16, #tpu.memory_space<vmem>>, vector<1x128x32xbf16>
    %153 = vector.shape_cast %152 : vector<1x128x32xbf16> to vector<128x32xbf16>
    %cst_55 = arith.constant dense<0.000000e+00> : vector<16x32xf32>
    %154 = tpu.matmul %151, %153, %cst_55 {dimension_numbers = #tpu.dot_dimension_numbers<[1], [0], [0], [1], [0, 0, 1, 1], [], []>} : vector<16x128xbf16>, vector<128x32xbf16>, vector<16x32xf32> -> vector<16x32xf32>
    %155 = arith.addf %109, %154 : vector<16x32xf32>
    %156 = vector.broadcast %10 : vector<1x32xf32> to vector<16x32xf32>
    %157 = arith.addf %155, %156 : vector<16x32xf32>
    %c1 = arith.constant 1 : index
    %c0_56 = arith.constant 0 : index
    %c0_57 = arith.constant 0 : index
    %158 = vector.load %arg3[%c1, %c0_56, %c0_57] : memref<2x6x32xf32, #tpu.memory_space<vmem>>, vector<1x6x32xf32>
    %159 = vector.shape_cast %158 : vector<1x6x32xf32> to vector<6x32xf32>
    %160 = vector.extract_strided_slice %159 {offsets = [0, 0], sizes = [1, 32], strides = [1, 1]} : vector<6x32xf32> to vector<1x32xf32>
    %161 = vector.extract_strided_slice %159 {offsets = [1, 0], sizes = [1, 32], strides = [1, 1]} : vector<6x32xf32> to vector<1x32xf32>
    %162 = vector.extract_strided_slice %159 {offsets = [2, 0], sizes = [1, 32], strides = [1, 1]} : vector<6x32xf32> to vector<1x32xf32>
    %163 = vector.extract_strided_slice %159 {offsets = [3, 0], sizes = [1, 32], strides = [1, 1]} : vector<6x32xf32> to vector<1x32xf32>
    %164 = vector.extract_strided_slice %159 {offsets = [4, 0], sizes = [1, 32], strides = [1, 1]} : vector<6x32xf32> to vector<1x32xf32>
    %165 = vector.extract_strided_slice %159 {offsets = [5, 0], sizes = [1, 32], strides = [1, 1]} : vector<6x32xf32> to vector<1x32xf32>
    %cst_58 = arith.constant dense<0.000000e+00> : vector<16xf32>
    %166 = vector.multi_reduction <add>, %157, %cst_58 [1] : vector<16x32xf32> to vector<16xf32>
    %167 = vector.shape_cast %166 : vector<16xf32> to vector<16x1xf32>
    %cst_59 = arith.constant 3.200000e+01 : f32
    %168 = vector.broadcast %cst_59 : f32 to vector<16x1xf32>
    %169 = arith.divf %167, %168 : vector<16x1xf32>
    %170 = vector.broadcast %169 : vector<16x1xf32> to vector<16x32xf32>
    %171 = arith.subf %157, %170 : vector<16x32xf32>
    %172 = arith.mulf %171, %171 : vector<16x32xf32>
    %cst_60 = arith.constant dense<0.000000e+00> : vector<16xf32>
    %173 = vector.multi_reduction <add>, %172, %cst_60 [1] : vector<16x32xf32> to vector<16xf32>
    %174 = vector.shape_cast %173 : vector<16xf32> to vector<16x1xf32>
    %cst_61 = arith.constant 3.200000e+01 : f32
    %175 = vector.broadcast %cst_61 : f32 to vector<16x1xf32>
    %176 = arith.divf %174, %175 : vector<16x1xf32>
    %cst_62 = arith.constant 9.99999974E-6 : f32
    %177 = vector.broadcast %cst_62 : f32 to vector<16x1xf32>
    %178 = arith.addf %176, %177 : vector<16x1xf32>
    %179 = math.rsqrt %178 : vector<16x1xf32>
    %180 = vector.broadcast %179 : vector<16x1xf32> to vector<16x32xf32>
    %181 = arith.mulf %171, %180 : vector<16x32xf32>
    %182 = vector.broadcast %160 : vector<1x32xf32> to vector<16x32xf32>
    %183 = arith.mulf %181, %182 : vector<16x32xf32>
    %184 = vector.broadcast %161 : vector<1x32xf32> to vector<16x32xf32>
    %185 = arith.addf %183, %184 : vector<16x32xf32>
    %186 = arith.truncf %185 : vector<16x32xf32> to vector<16x32xbf16>
    %c1_63 = arith.constant 1 : index
    %c0_64 = arith.constant 0 : index
    %c0_65 = arith.constant 0 : index
    %187 = vector.load %arg4[%c1_63, %c0_64, %c0_65] : memref<2x32x96xbf16, #tpu.memory_space<vmem>>, vector<1x32x96xbf16>
    %188 = vector.shape_cast %187 : vector<1x32x96xbf16> to vector<32x96xbf16>
    %cst_66 = arith.constant dense<0.000000e+00> : vector<16x96xf32>
    %189 = tpu.matmul %186, %188, %cst_66 {dimension_numbers = #tpu.dot_dimension_numbers<[1], [0], [0], [1], [0, 0, 1, 1], [], []>} : vector<16x32xbf16>, vector<32x96xbf16>, vector<16x96xf32> -> vector<16x96xf32>
    %c1_67 = arith.constant 1 : index
    %c0_68 = arith.constant 0 : index
    %c0_69 = arith.constant 0 : index
    %190 = vector.load %arg5[%c1_67, %c0_68, %c0_69] : memref<2x1x96xf32, #tpu.memory_space<vmem>>, vector<1x1x96xf32>
    %191 = vector.shape_cast %190 : vector<1x1x96xf32> to vector<1x96xf32>
    %192 = vector.broadcast %191 : vector<1x96xf32> to vector<16x96xf32>
    %193 = arith.addf %189, %192 : vector<16x96xf32>
    %194 = vector.extract_strided_slice %193 {offsets = [0, 0], sizes = [16, 8], strides = [1, 1]} : vector<16x96xf32> to vector<16x8xf32>
    %195 = vector.extract_strided_slice %193 {offsets = [0, 32], sizes = [16, 8], strides = [1, 1]} : vector<16x96xf32> to vector<16x8xf32>
    %196 = arith.truncf %194 : vector<16x8xf32> to vector<16x8xbf16>
    %197 = arith.truncf %195 : vector<16x8xf32> to vector<16x8xbf16>
    %cst_70 = arith.constant dense<0.000000e+00> : vector<16x16xf32>
    %198 = tpu.matmul %196, %197, %cst_70 {dimension_numbers = #tpu.dot_dimension_numbers<[1], [1], [0], [0], [0, 0, 1, 0], [], []>} : vector<16x8xbf16>, vector<16x8xbf16>, vector<16x16xf32> -> vector<16x16xf32>
    %cst_71 = arith.constant 0.353553385 : f32
    %199 = vector.broadcast %cst_71 : f32 to vector<16x16xf32>
    %200 = arith.mulf %198, %199 : vector<16x16xf32>
    %201 = arith.addf %200, %2 : vector<16x16xf32>
    %202 = vector.extract_strided_slice %193 {offsets = [0, 8], sizes = [16, 8], strides = [1, 1]} : vector<16x96xf32> to vector<16x8xf32>
    %203 = vector.extract_strided_slice %193 {offsets = [0, 40], sizes = [16, 8], strides = [1, 1]} : vector<16x96xf32> to vector<16x8xf32>
    %204 = arith.truncf %202 : vector<16x8xf32> to vector<16x8xbf16>
    %205 = arith.truncf %203 : vector<16x8xf32> to vector<16x8xbf16>
    %cst_72 = arith.constant dense<0.000000e+00> : vector<16x16xf32>
    %206 = tpu.matmul %204, %205, %cst_72 {dimension_numbers = #tpu.dot_dimension_numbers<[1], [1], [0], [0], [0, 0, 1, 0], [], []>} : vector<16x8xbf16>, vector<16x8xbf16>, vector<16x16xf32> -> vector<16x16xf32>
    %cst_73 = arith.constant 0.353553385 : f32
    %207 = vector.broadcast %cst_73 : f32 to vector<16x16xf32>
    %208 = arith.mulf %206, %207 : vector<16x16xf32>
    %209 = arith.addf %208, %2 : vector<16x16xf32>
    %210 = vector.extract_strided_slice %193 {offsets = [0, 16], sizes = [16, 8], strides = [1, 1]} : vector<16x96xf32> to vector<16x8xf32>
    %211 = vector.extract_strided_slice %193 {offsets = [0, 48], sizes = [16, 8], strides = [1, 1]} : vector<16x96xf32> to vector<16x8xf32>
    %212 = arith.truncf %210 : vector<16x8xf32> to vector<16x8xbf16>
    %213 = arith.truncf %211 : vector<16x8xf32> to vector<16x8xbf16>
    %cst_74 = arith.constant dense<0.000000e+00> : vector<16x16xf32>
    %214 = tpu.matmul %212, %213, %cst_74 {dimension_numbers = #tpu.dot_dimension_numbers<[1], [1], [0], [0], [0, 0, 1, 0], [], []>} : vector<16x8xbf16>, vector<16x8xbf16>, vector<16x16xf32> -> vector<16x16xf32>
    %cst_75 = arith.constant 0.353553385 : f32
    %215 = vector.broadcast %cst_75 : f32 to vector<16x16xf32>
    %216 = arith.mulf %214, %215 : vector<16x16xf32>
    %217 = arith.addf %216, %2 : vector<16x16xf32>
    %218 = vector.extract_strided_slice %193 {offsets = [0, 24], sizes = [16, 8], strides = [1, 1]} : vector<16x96xf32> to vector<16x8xf32>
    %219 = vector.extract_strided_slice %193 {offsets = [0, 56], sizes = [16, 8], strides = [1, 1]} : vector<16x96xf32> to vector<16x8xf32>
    %220 = arith.truncf %218 : vector<16x8xf32> to vector<16x8xbf16>
    %221 = arith.truncf %219 : vector<16x8xf32> to vector<16x8xbf16>
    %cst_76 = arith.constant dense<0.000000e+00> : vector<16x16xf32>
    %222 = tpu.matmul %220, %221, %cst_76 {dimension_numbers = #tpu.dot_dimension_numbers<[1], [1], [0], [0], [0, 0, 1, 0], [], []>} : vector<16x8xbf16>, vector<16x8xbf16>, vector<16x16xf32> -> vector<16x16xf32>
    %cst_77 = arith.constant 0.353553385 : f32
    %223 = vector.broadcast %cst_77 : f32 to vector<16x16xf32>
    %224 = arith.mulf %222, %223 : vector<16x16xf32>
    %225 = arith.addf %224, %2 : vector<16x16xf32>
    %226 = tpu.concatenate %201, %209, %217, %225 in 0 : vector<16x16xf32>, vector<16x16xf32>, vector<16x16xf32>, vector<16x16xf32> -> vector<64x16xf32>
    %cst_78 = arith.constant dense<0xFF800000> : vector<64xf32>
    %227 = vector.multi_reduction <maximumf>, %226, %cst_78 [1] : vector<64x16xf32> to vector<64xf32>
    %228 = vector.shape_cast %227 : vector<64xf32> to vector<64x1xf32>
    %229 = vector.broadcast %228 : vector<64x1xf32> to vector<64x16xf32>
    %230 = arith.subf %226, %229 : vector<64x16xf32>
    %231 = math.exp %230 : vector<64x16xf32>
    %cst_79 = arith.constant dense<0.000000e+00> : vector<64xf32>
    %232 = vector.multi_reduction <add>, %231, %cst_79 [1] : vector<64x16xf32> to vector<64xf32>
    %233 = vector.shape_cast %232 : vector<64xf32> to vector<64x1xf32>
    %234 = tpu.reciprocal %233 {approx = true} : vector<64x1xf32> -> vector<64x1xf32>
    %235 = vector.broadcast %234 : vector<64x1xf32> to vector<64x16xf32>
    %236 = arith.mulf %231, %235 : vector<64x16xf32>
    %237 = vector.extract_strided_slice %236 {offsets = [0, 0], sizes = [16, 16], strides = [1, 1]} : vector<64x16xf32> to vector<16x16xf32>
    %238 = vector.extract_strided_slice %193 {offsets = [0, 64], sizes = [16, 8], strides = [1, 1]} : vector<16x96xf32> to vector<16x8xf32>
    %239 = arith.truncf %237 : vector<16x16xf32> to vector<16x16xbf16>
    %240 = arith.truncf %238 : vector<16x8xf32> to vector<16x8xbf16>
    %cst_80 = arith.constant dense<0.000000e+00> : vector<16x8xf32>
    %241 = tpu.matmul %239, %240, %cst_80 {dimension_numbers = #tpu.dot_dimension_numbers<[1], [0], [0], [1], [0, 0, 1, 1], [], []>} : vector<16x16xbf16>, vector<16x8xbf16>, vector<16x8xf32> -> vector<16x8xf32>
    %242 = vector.extract_strided_slice %236 {offsets = [16, 0], sizes = [16, 16], strides = [1, 1]} : vector<64x16xf32> to vector<16x16xf32>
    %243 = vector.extract_strided_slice %193 {offsets = [0, 72], sizes = [16, 8], strides = [1, 1]} : vector<16x96xf32> to vector<16x8xf32>
    %244 = arith.truncf %242 : vector<16x16xf32> to vector<16x16xbf16>
    %245 = arith.truncf %243 : vector<16x8xf32> to vector<16x8xbf16>
    %cst_81 = arith.constant dense<0.000000e+00> : vector<16x8xf32>
    %246 = tpu.matmul %244, %245, %cst_81 {dimension_numbers = #tpu.dot_dimension_numbers<[1], [0], [0], [1], [0, 0, 1, 1], [], []>} : vector<16x16xbf16>, vector<16x8xbf16>, vector<16x8xf32> -> vector<16x8xf32>
    %247 = vector.extract_strided_slice %236 {offsets = [32, 0], sizes = [16, 16], strides = [1, 1]} : vector<64x16xf32> to vector<16x16xf32>
    %248 = vector.extract_strided_slice %193 {offsets = [0, 80], sizes = [16, 8], strides = [1, 1]} : vector<16x96xf32> to vector<16x8xf32>
    %249 = arith.truncf %247 : vector<16x16xf32> to vector<16x16xbf16>
    %250 = arith.truncf %248 : vector<16x8xf32> to vector<16x8xbf16>
    %cst_82 = arith.constant dense<0.000000e+00> : vector<16x8xf32>
    %251 = tpu.matmul %249, %250, %cst_82 {dimension_numbers = #tpu.dot_dimension_numbers<[1], [0], [0], [1], [0, 0, 1, 1], [], []>} : vector<16x16xbf16>, vector<16x8xbf16>, vector<16x8xf32> -> vector<16x8xf32>
    %252 = vector.extract_strided_slice %236 {offsets = [48, 0], sizes = [16, 16], strides = [1, 1]} : vector<64x16xf32> to vector<16x16xf32>
    %253 = vector.extract_strided_slice %193 {offsets = [0, 88], sizes = [16, 8], strides = [1, 1]} : vector<16x96xf32> to vector<16x8xf32>
    %254 = arith.truncf %252 : vector<16x16xf32> to vector<16x16xbf16>
    %255 = arith.truncf %253 : vector<16x8xf32> to vector<16x8xbf16>
    %cst_83 = arith.constant dense<0.000000e+00> : vector<16x8xf32>
    %256 = tpu.matmul %254, %255, %cst_83 {dimension_numbers = #tpu.dot_dimension_numbers<[1], [0], [0], [1], [0, 0, 1, 1], [], []>} : vector<16x16xbf16>, vector<16x8xbf16>, vector<16x8xf32> -> vector<16x8xf32>
    %257 = tpu.concatenate %241, %246, %251, %256 in 1 : vector<16x8xf32>, vector<16x8xf32>, vector<16x8xf32>, vector<16x8xf32> -> vector<16x32xf32>
    %258 = arith.truncf %257 : vector<16x32xf32> to vector<16x32xbf16>
    %c1_84 = arith.constant 1 : index
    %c0_85 = arith.constant 0 : index
    %c0_86 = arith.constant 0 : index
    %259 = vector.load %arg6[%c1_84, %c0_85, %c0_86] : memref<2x32x32xbf16, #tpu.memory_space<vmem>>, vector<1x32x32xbf16>
    %260 = vector.shape_cast %259 : vector<1x32x32xbf16> to vector<32x32xbf16>
    %cst_87 = arith.constant dense<0.000000e+00> : vector<16x32xf32>
    %261 = tpu.matmul %258, %260, %cst_87 {dimension_numbers = #tpu.dot_dimension_numbers<[1], [0], [0], [1], [0, 0, 1, 1], [], []>} : vector<16x32xbf16>, vector<32x32xbf16>, vector<16x32xf32> -> vector<16x32xf32>
    %262 = arith.addf %157, %261 : vector<16x32xf32>
    %263 = vector.broadcast %162 : vector<1x32xf32> to vector<16x32xf32>
    %264 = arith.addf %262, %263 : vector<16x32xf32>
    %cst_88 = arith.constant dense<0.000000e+00> : vector<16xf32>
    %265 = vector.multi_reduction <add>, %264, %cst_88 [1] : vector<16x32xf32> to vector<16xf32>
    %266 = vector.shape_cast %265 : vector<16xf32> to vector<16x1xf32>
    %cst_89 = arith.constant 3.200000e+01 : f32
    %267 = vector.broadcast %cst_89 : f32 to vector<16x1xf32>
    %268 = arith.divf %266, %267 : vector<16x1xf32>
    %269 = vector.broadcast %268 : vector<16x1xf32> to vector<16x32xf32>
    %270 = arith.subf %264, %269 : vector<16x32xf32>
    %271 = arith.mulf %270, %270 : vector<16x32xf32>
    %cst_90 = arith.constant dense<0.000000e+00> : vector<16xf32>
    %272 = vector.multi_reduction <add>, %271, %cst_90 [1] : vector<16x32xf32> to vector<16xf32>
    %273 = vector.shape_cast %272 : vector<16xf32> to vector<16x1xf32>
    %cst_91 = arith.constant 3.200000e+01 : f32
    %274 = vector.broadcast %cst_91 : f32 to vector<16x1xf32>
    %275 = arith.divf %273, %274 : vector<16x1xf32>
    %cst_92 = arith.constant 9.99999974E-6 : f32
    %276 = vector.broadcast %cst_92 : f32 to vector<16x1xf32>
    %277 = arith.addf %275, %276 : vector<16x1xf32>
    %278 = math.rsqrt %277 : vector<16x1xf32>
    %279 = vector.broadcast %278 : vector<16x1xf32> to vector<16x32xf32>
    %280 = arith.mulf %270, %279 : vector<16x32xf32>
    %281 = vector.broadcast %163 : vector<1x32xf32> to vector<16x32xf32>
    %282 = arith.mulf %280, %281 : vector<16x32xf32>
    %283 = vector.broadcast %164 : vector<1x32xf32> to vector<16x32xf32>
    %284 = arith.addf %282, %283 : vector<16x32xf32>
    %285 = arith.truncf %284 : vector<16x32xf32> to vector<16x32xbf16>
    %c1_93 = arith.constant 1 : index
    %c0_94 = arith.constant 0 : index
    %c0_95 = arith.constant 0 : index
    %286 = vector.load %arg7[%c1_93, %c0_94, %c0_95] : memref<2x32x128xbf16, #tpu.memory_space<vmem>>, vector<1x32x128xbf16>
    %287 = vector.shape_cast %286 : vector<1x32x128xbf16> to vector<32x128xbf16>
    %cst_96 = arith.constant dense<0.000000e+00> : vector<16x128xf32>
    %288 = tpu.matmul %285, %287, %cst_96 {dimension_numbers = #tpu.dot_dimension_numbers<[1], [0], [0], [1], [0, 0, 1, 1], [], []>} : vector<16x32xbf16>, vector<32x128xbf16>, vector<16x128xf32> -> vector<16x128xf32>
    %c1_97 = arith.constant 1 : index
    %c0_98 = arith.constant 0 : index
    %c0_99 = arith.constant 0 : index
    %289 = vector.load %arg8[%c1_97, %c0_98, %c0_99] : memref<2x1x128xf32, #tpu.memory_space<vmem>>, vector<1x1x128xf32>
    %290 = vector.shape_cast %289 : vector<1x1x128xf32> to vector<1x128xf32>
    %291 = vector.broadcast %290 : vector<1x128xf32> to vector<16x128xf32>
    %292 = arith.addf %288, %291 : vector<16x128xf32>
    %293 = arith.mulf %292, %292 : vector<16x128xf32>
    %294 = arith.mulf %292, %293 : vector<16x128xf32>
    %cst_100 = arith.constant 4.471500e-02 : f32
    %295 = vector.broadcast %cst_100 : f32 to vector<16x128xf32>
    %296 = arith.mulf %295, %294 : vector<16x128xf32>
    %297 = arith.addf %292, %296 : vector<16x128xf32>
    %cst_101 = arith.constant 0.797884583 : f32
    %298 = vector.broadcast %cst_101 : f32 to vector<16x128xf32>
    %299 = arith.mulf %298, %297 : vector<16x128xf32>
    %300 = math.tanh %299 : vector<16x128xf32>
    %cst_102 = arith.constant 1.000000e+00 : f32
    %301 = vector.broadcast %cst_102 : f32 to vector<16x128xf32>
    %302 = arith.addf %301, %300 : vector<16x128xf32>
    %cst_103 = arith.constant 5.000000e-01 : f32
    %303 = vector.broadcast %cst_103 : f32 to vector<16x128xf32>
    %304 = arith.mulf %303, %302 : vector<16x128xf32>
    %305 = arith.mulf %292, %304 : vector<16x128xf32>
    %306 = arith.truncf %305 : vector<16x128xf32> to vector<16x128xbf16>
    %c1_104 = arith.constant 1 : index
    %c0_105 = arith.constant 0 : index
    %c0_106 = arith.constant 0 : index
    %307 = vector.load %arg9[%c1_104, %c0_105, %c0_106] : memref<2x128x32xbf16, #tpu.memory_space<vmem>>, vector<1x128x32xbf16>
    %308 = vector.shape_cast %307 : vector<1x128x32xbf16> to vector<128x32xbf16>
    %cst_107 = arith.constant dense<0.000000e+00> : vector<16x32xf32>
    %309 = tpu.matmul %306, %308, %cst_107 {dimension_numbers = #tpu.dot_dimension_numbers<[1], [0], [0], [1], [0, 0, 1, 1], [], []>} : vector<16x128xbf16>, vector<128x32xbf16>, vector<16x32xf32> -> vector<16x32xf32>
    %310 = arith.addf %264, %309 : vector<16x32xf32>
    %311 = vector.broadcast %165 : vector<1x32xf32> to vector<16x32xf32>
    %312 = arith.addf %310, %311 : vector<16x32xf32>
    %c0_108 = arith.constant 0 : index
    %c0_109 = arith.constant 0 : index
    %313 = vector.load %arg10[%c0_108, %c0_109] : memref<2x32xf32, #tpu.memory_space<vmem>>, vector<2x32xf32>
    %314 = vector.extract_strided_slice %313 {offsets = [0, 0], sizes = [1, 32], strides = [1, 1]} : vector<2x32xf32> to vector<1x32xf32>
    %315 = vector.extract_strided_slice %313 {offsets = [1, 0], sizes = [1, 32], strides = [1, 1]} : vector<2x32xf32> to vector<1x32xf32>
    %cst_110 = arith.constant dense<0.000000e+00> : vector<16xf32>
    %316 = vector.multi_reduction <add>, %312, %cst_110 [1] : vector<16x32xf32> to vector<16xf32>
    %317 = vector.shape_cast %316 : vector<16xf32> to vector<16x1xf32>
    %cst_111 = arith.constant 3.200000e+01 : f32
    %318 = vector.broadcast %cst_111 : f32 to vector<16x1xf32>
    %319 = arith.divf %317, %318 : vector<16x1xf32>
    %320 = vector.broadcast %319 : vector<16x1xf32> to vector<16x32xf32>
    %321 = arith.subf %312, %320 : vector<16x32xf32>
    %322 = arith.mulf %321, %321 : vector<16x32xf32>
    %cst_112 = arith.constant dense<0.000000e+00> : vector<16xf32>
    %323 = vector.multi_reduction <add>, %322, %cst_112 [1] : vector<16x32xf32> to vector<16xf32>
    %324 = vector.shape_cast %323 : vector<16xf32> to vector<16x1xf32>
    %cst_113 = arith.constant 3.200000e+01 : f32
    %325 = vector.broadcast %cst_113 : f32 to vector<16x1xf32>
    %326 = arith.divf %324, %325 : vector<16x1xf32>
    %cst_114 = arith.constant 9.99999974E-6 : f32
    %327 = vector.broadcast %cst_114 : f32 to vector<16x1xf32>
    %328 = arith.addf %326, %327 : vector<16x1xf32>
    %329 = math.rsqrt %328 : vector<16x1xf32>
    %330 = vector.broadcast %329 : vector<16x1xf32> to vector<16x32xf32>
    %331 = arith.mulf %321, %330 : vector<16x32xf32>
    %332 = vector.broadcast %314 : vector<1x32xf32> to vector<16x32xf32>
    %333 = arith.mulf %331, %332 : vector<16x32xf32>
    %334 = vector.broadcast %315 : vector<1x32xf32> to vector<16x32xf32>
    %335 = arith.addf %333, %334 : vector<16x32xf32>
    %336 = arith.truncf %335 : vector<16x32xf32> to vector<16x32xbf16>
    %c0_115 = arith.constant 0 : index
    %c0_116 = arith.constant 0 : index
    %337 = vector.load %arg11[%c0_115, %c0_116] : memref<32x256xbf16, #tpu.memory_space<vmem>>, vector<32x256xbf16>
    %cst_117 = arith.constant dense<0.000000e+00> : vector<16x256xf32>
    %338 = tpu.matmul %336, %337, %cst_117 {dimension_numbers = #tpu.dot_dimension_numbers<[1], [0], [0], [1], [0, 0, 1, 1], [], []>} : vector<16x32xbf16>, vector<32x256xbf16>, vector<16x256xf32> -> vector<16x256xf32>
    %339 = vector.extract_strided_slice %338 {offsets = [0, 0], sizes = [16, 128], strides = [1, 1]} : vector<16x256xf32> to vector<16x128xf32>
    %c0_118 = arith.constant 0 : index
    %c0_119 = arith.constant 0 : index
    %340 = vector.load %arg13[%c0_118, %c0_119] : memref<16x256xf32, #tpu.memory_space<vmem>>, vector<16x128xf32>
    tpu.vector_store %arg13[%c0_118, %c0_119], %339 {strides = array<i32>} : memref<16x256xf32, #tpu.memory_space<vmem>>, vector<16x128xf32>,
    %341 = vector.extract_strided_slice %338 {offsets = [0, 128], sizes = [16, 128], strides = [1, 1]} : vector<16x256xf32> to vector<16x128xf32>
    %c0_120 = arith.constant 0 : index
    %c0_121 = arith.constant 0 : index
    %342 = vector.load %arg12[%c0_120, %c0_121] : memref<3x128xf32, #tpu.memory_space<vmem>>, vector<1x128xf32>
    %343 = vector.broadcast %342 : vector<1x128xf32> to vector<16x128xf32>
    %344 = arith.addf %341, %343 : vector<16x128xf32>
    %cst_122 = arith.constant 0.000000e+00 : f32
    %345 = vector.broadcast %cst_122 : f32 to vector<16x128xf32>
    %346 = arith.cmpf ogt, %344, %345 : vector<16x128xf32>
    %cst_123 = arith.constant 0.00999999977 : f32
    %347 = vector.broadcast %cst_123 : f32 to vector<16x128xf32>
    %348 = arith.mulf %347, %344 : vector<16x128xf32>
    %349 = arith.select %346, %344, %348 : vector<16x128xi1>, vector<16x128xf32>
    %c1_124 = arith.constant 1 : index
    %c0_125 = arith.constant 0 : index
    %350 = vector.load %arg12[%c1_124, %c0_125] : memref<3x128xf32, #tpu.memory_space<vmem>>, vector<1x128xf32>
    %351 = vector.broadcast %350 : vector<1x128xf32> to vector<16x128xf32>
    %352 = arith.mulf %349, %351 : vector<16x128xf32>
    %cst_126 = arith.constant dense<0.000000e+00> : vector<16xf32>
    %353 = vector.multi_reduction <add>, %352, %cst_126 [1] : vector<16x128xf32> to vector<16xf32>
    %354 = vector.shape_cast %353 : vector<16xf32> to vector<16x1xf32>
    %c2 = arith.constant 2 : index
    %c0_127 = arith.constant 0 : index
    %355 = vector.load %arg12[%c2, %c0_127] : memref<3x128xf32, #tpu.memory_space<vmem>>, vector<1x1xf32>
    %356 = vector.broadcast %355 : vector<1x1xf32> to vector<16x1xf32>
    %357 = arith.addf %354, %356 : vector<16x1xf32>
    %358 = vector.shape_cast %357 : vector<16x1xf32> to vector<16x1xf32>
    %359 = vector.broadcast %358 : vector<16x1xf32> to vector<16x128xf32>
    %c0_128 = arith.constant 0 : index
    %c128 = arith.constant 128 : index
    %360 = vector.load %arg13[%c0_128, %c128] : memref<16x256xf32, #tpu.memory_space<vmem>>, vector<16x128xf32>
    tpu.vector_store %arg13[%c0_128, %c128], %359 {strides = array<i32>} : memref<16x256xf32, #tpu.memory_space<vmem>>, vector<16x128xf32>,
    return
  }
  func.func @transform_0(%arg0: i32) -> (i32, i32) {
    %c0_i32 = arith.constant 0 : i32
    %c0_i32_0 = arith.constant 0 : i32
    return %arg0, %c0_i32 : i32, i32
  }
  func.func @transform_1(%arg0: i32) -> (i32, i32, i32) {
    %c0_i32 = arith.constant 0 : i32
    %c0_i32_0 = arith.constant 0 : i32
    %c0_i32_1 = arith.constant 0 : i32
    return %arg0, %c0_i32, %c0_i32_0 : i32, i32, i32
  }
  func.func @transform_2(%arg0: i32) -> (i32, i32, i32) {
    %c0_i32 = arith.constant 0 : i32
    %c0_i32_0 = arith.constant 0 : i32
    %c0_i32_1 = arith.constant 0 : i32
    %c0_i32_2 = arith.constant 0 : i32
    return %c0_i32, %c0_i32_0, %c0_i32_1 : i32, i32, i32
  }
  func.func @transform_3(%arg0: i32) -> (i32, i32, i32) {
    %c0_i32 = arith.constant 0 : i32
    %c0_i32_0 = arith.constant 0 : i32
    %c0_i32_1 = arith.constant 0 : i32
    %c0_i32_2 = arith.constant 0 : i32
    return %c0_i32, %c0_i32_0, %c0_i32_1 : i32, i32, i32
  }
  func.func @transform_4(%arg0: i32) -> (i32, i32, i32) {
    %c0_i32 = arith.constant 0 : i32
    %c0_i32_0 = arith.constant 0 : i32
    %c0_i32_1 = arith.constant 0 : i32
    %c0_i32_2 = arith.constant 0 : i32
    return %c0_i32, %c0_i32_0, %c0_i32_1 : i32, i32, i32
  }
  func.func @transform_5(%arg0: i32) -> (i32, i32, i32) {
    %c0_i32 = arith.constant 0 : i32
    %c0_i32_0 = arith.constant 0 : i32
    %c0_i32_1 = arith.constant 0 : i32
    %c0_i32_2 = arith.constant 0 : i32
    return %c0_i32, %c0_i32_0, %c0_i32_1 : i32, i32, i32
  }
  func.func @transform_6(%arg0: i32) -> (i32, i32, i32) {
    %c0_i32 = arith.constant 0 : i32
    %c0_i32_0 = arith.constant 0 : i32
    %c0_i32_1 = arith.constant 0 : i32
    %c0_i32_2 = arith.constant 0 : i32
    return %c0_i32, %c0_i32_0, %c0_i32_1 : i32, i32, i32
  }
  func.func @transform_7(%arg0: i32) -> (i32, i32, i32) {
    %c0_i32 = arith.constant 0 : i32
    %c0_i32_0 = arith.constant 0 : i32
    %c0_i32_1 = arith.constant 0 : i32
    %c0_i32_2 = arith.constant 0 : i32
    return %c0_i32, %c0_i32_0, %c0_i32_1 : i32, i32, i32
  }
  func.func @transform_8(%arg0: i32) -> (i32, i32, i32) {
    %c0_i32 = arith.constant 0 : i32
    %c0_i32_0 = arith.constant 0 : i32
    %c0_i32_1 = arith.constant 0 : i32
    %c0_i32_2 = arith.constant 0 : i32
    return %c0_i32, %c0_i32_0, %c0_i32_1 : i32, i32, i32
  }
  func.func @transform_9(%arg0: i32) -> (i32, i32) {
    %c0_i32 = arith.constant 0 : i32
    %c0_i32_0 = arith.constant 0 : i32
    %c0_i32_1 = arith.constant 0 : i32
    return %c0_i32, %c0_i32_0 : i32, i32
  }
  func.func @transform_10(%arg0: i32) -> (i32, i32) {
    %c0_i32 = arith.constant 0 : i32
    %c0_i32_0 = arith.constant 0 : i32
    %c0_i32_1 = arith.constant 0 : i32
    return %c0_i32, %c0_i32_0 : i32, i32
  }
  func.func @transform_11(%arg0: i32) -> (i32, i32) {
    %c0_i32 = arith.constant 0 : i32
    %c0_i32_0 = arith.constant 0 : i32
    %c0_i32_1 = arith.constant 0 : i32
    return %c0_i32, %c0_i32_0 : i32, i32
  }
  func.func @transform_12(%arg0: i32) -> (i32, i32) {
    %c0_i32 = arith.constant 0 : i32
    %c0_i32_0 = arith.constant 0 : i32
    return %arg0, %c0_i32 : i32, i32
  }
}

</mosaic_0001>

<bundles_post_ra>
// kernel: gptactor_forward.1
= control target key start
LH: loop header
LB: loop body
LE: loop exit
PB: predicated region body
PF: predicated region fallthrough
CT: control target
= control target key end

     0   :  { %vm47_vm0 = vcmask 261120   ;;  %v2626_v14 = vmov 0.0   ;;  %vm2627_vm1 = vmmov 0   ;;  %v75_v23 = vlaneseq  ;;  %s2628_s14 = smov 88   ;;  %s2629_s15 = smov 96   ;;  %s3217_s0 = inlined_call_operand.vmem [shape: f32[16,32], index: 0, kind: input, shape index: {}]   ;;  %s3218_s3 = inlined_call_operand.vmem [shape: bf16[2,32,96], index: 3, kind: input, shape index: {}]   ;;  %s3219_s2 = inlined_call_operand.vmem [shape: f32[2,6,32], index: 2, kind: input, shape index: {}]   ;;  %s3220_s4 = inlined_call_operand.vmem [shape: f32[2,1,96], index: 4, kind: input, shape index: {}]   ;;  %s3221_s1 = inlined_call_operand.vmem [shape: f32[1,16,16], index: 1, kind: input, shape index: {}]   ;;  %s3222_s5 = inlined_call_operand.vmem [shape: bf16[2,32,32], index: 5, kind: input, shape index: {}]   ;;  %s3223_s6 = inlined_call_operand.vmem [shape: bf16[2,32,128], index: 6, kind: input, shape index: {}]   ;;  %s3224_s8 = inlined_call_operand.vmem [shape: bf16[2,128,32], index: 8, kind: input, shape index: {}]   ;;  %s3225_s7 = inlined_call_operand.vmem [shape: f32[2,1,128], index: 7, kind: input, shape index: {}]   ;;  %s3226_s10 = inlined_call_operand.vmem [shape: bf16[32,256], index: 10, kind: input, shape index: {}]   ;;  %s3227_s9 = inlined_call_operand.vmem [shape: f32[2,32], index: 9, kind: input, shape index: {}]   ;;  %s3228_s11 = inlined_call_operand.vmem [shape: f32[3,128], index: 11, kind: input, shape index: {}]   ;;  %s3229_s12 = inlined_call_operand.vmem [shape: f32[16,256], index: 12, kind: output, shape index: {}]  }
   0x1   :  { %v2711_v0 = vld [vmem:[%s3217_s0] sm:$0xff]  ;;  %v2716_v1 = vld [vmem:[%s3217_s0 + $0x8] sm:$0xff]  ;;  %2266 = vmatprep.subr.bf16.mxu1 %v2626_v14  ;;  %2270 = vmatprep.mubr.msk.bf16.mxu1 %vm2627_vm1, %v2626_v14  ;;  %s2630_s16 = smov 80   ;;  %s2631_s17 = smov 72   ;;  %vm159_vm2 = vcmask 64512   ;;  %vm376_vm3 = vcmask 130048  }
   0x2   :  { %v48_v2 = vsel %vm47_vm0, %v2711_v0, 0.0  ;;  %v51_v3 = vsel %vm47_vm0, %v2716_v1, 0.0  ;;  %v2499_v15 = vld [vmem:[%s3218_s3 + $0x8] sm:$0xff]   ;;  %2280 = vmatprep.subr.bf16.mxu0 %v2626_v14  ;;  %2282 = vmatprep.mubr.msk.bf16.mxu0 %vm2627_vm1, %v2626_v14  ;;  %v2500_v16 = vld [vmem:[%s3218_s3] sm:$0xff]   ;;  %v2740_v24 = vshrl.u32 %v75_v23, 7  ;;  %s2632_s18 = smov 120  }
   0x3   :  { %49 = vadd.xlane.f32.xlu0 %v48_v2  ;;  %2267 = vmatpush3.bf16.msra.mxu1 %v2499_v15  ;;  %v2748_v26 = vld [vmem:[%s3219_s2] sm:$0x3f]  ;;  %s2633_s19 = smov 104   ;;  %s2634_s20 = smov 112   ;;  %vm685_vm4 = vcmask 195584  }
   0x4   :  { %2268 = vmatprep.subr.bf16.mxu1 %v2626_v14  ;;  %v2743_v25 = vsub.s32 0, %v2740_v24  ;;  %v2753_v30 = vsub.s32 1, %v2740_v24  ;;  %v2105_v40 = vld [vmem:[%s3220_s4] ss:$0 sm:$0xff]  ;;  %s2635_s0 = smov 64   ;;  %s2636_s25 = smov 48  }
   0x5   :  { %v2803_v60 = vld [vmem:[%s3221_s1] sm:$0xff]  ;;  %s2637_s26 = smov 40   ;;  %s2638_s27 = smov 56  }
   0x6   :  { %v78_v29 = vrot.slane %v2748_v26, %v2743_v25  ;;  %v84_v34 = vrot.slane %v2748_v26, %v2753_v30  ;;  %s2639_s21 = smov 8   ;;  %s3231_s22 = smov 16  }
   0x7   :  { %52 = vadd.xlane.f32.xlu0 %v51_v3  ;;  %2269 = vmatpush3.bf16.msra.mxu1 %v2500_v16  ;;  %s3230_s23 = smov 24  }
   0x8   :  { %2274 = vmatprep.subr.bf16.mxu1 %v2626_v14 }
  0x8c   :  { %v50_v4 = vpop.xlane.xlu0 %49 }
  0x8d   :  { %v55_v5 = vmul.f32 0.03125, %v50_v4 }
  0x8f   :  { %v57_v6 = vsub.f32 %v2711_v0, %v55_v5 }
  0x90   :  { %v53_v7 = vpop.xlane.xlu0 %52 }
  0x91   :  { %v56_v8 = vmul.f32 0.03125, %v53_v7  ;;  %v59_v9 = vmul.f32 %v57_v6, %v57_v6  ;;  %v2810_v7 = vld [vmem:[%s3221_s1 + $0x8] sm:$0xff] }
  0x93   :  { %v58_v10 = vsub.f32 %v2716_v1, %v56_v8  ;;  %v61_v11 = vsel %vm47_vm0, %v59_v9, 0.0 }
  0x94   :  { %62 = vadd.xlane.f32.xlu1 %v61_v11 }
  0x95   :  { %v60_v12 = vmul.f32 %v58_v10, %v58_v10 }
  0x97   :  { %v64_v13 = vsel %vm47_vm0, %v60_v12, 0.0 }
  0x98   :  { %65 = vadd.xlane.f32.xlu1 %v64_v13 }
 0x11d   :  { %v63_v17 = vpop.xlane.xlu1 %62 }
 0x11e   :  { %v67_v18 = vmul.f32 0.03125, %v63_v17 }
 0x120   :  { %v69_v19 = vadd.f32 1e-05, %v67_v18 }
 0x121   :  { %v66_v20 = vpop.xlane.xlu1 %65 }
 0x122   :  { %2533 = vrsqrt.f32 %v69_v19  ;;  %v68_v21 = vmul.f32 0.03125, %v66_v20 }
 0x124   :  { %v70_v22 = vadd.f32 1e-05, %v68_v21 }
 0x126   :  { %2535 = vrsqrt.f32 %v70_v22 }
 0x12f   :  { %v2534_v27 = vpop.eup %2533 }
 0x130   :  { %v73_v28 = vmul.f32 %v2534_v27, %v57_v6 }
 0x132   :  { %v79_v33 = vmul.f32 %v78_v29, %v73_v28 }
 0x133   :  { %v2536_v31 = vpop.eup %2535 }
 0x134   :  { %v74_v32 = vmul.f32 %v2536_v31, %v58_v10  ;;  %v85_v36 = vadd.f32 %v84_v34, %v79_v33 }
 0x136   :  { %v80_v35 = vmul.f32 %v78_v29, %v74_v32 }
 0x138   :  { %v86_v37 = vadd.f32 %v84_v34, %v80_v35 }
 0x13a   :  { %v87_v38 = vpack.c.bf16 %v86_v37, %v85_v36 }
 0x13c   :  { %2271 = vmatmul.mubr.msk.bf16.vlgmr.msra.gmra.mxu1 %vm47_vm0, %v87_v38 }
 0x13d   :  { %2276 = vmatprep.mubr.msk.bf16.mxu1 %vm2627_vm1, %v2626_v14 }
 0x1fc   :  { %v148_v39 = vpop.f32.mrf.mxu1 }
 0x1fd   :  { %v149_v43 = vadd.f32 %v2105_v40, %v148_v39 }
 0x1fe   :  { %v2272_v41 = vpop.f32.mrf.mxu1 }
 0x200   :  { %v151_v42 = vpop.f32.mrf.mxu1 }
 0x201   :  { %v152_v44 = vadd.f32 %v2105_v40, %v151_v42 }
 0x202   :  { %v2273_v45 = vpop.f32.mrf.mxu1 }
 0x203   :  { %v2763_v46 = vpack.c.bf16 %v152_v44, %v149_v43 }
 0x205   :  { %213 = vrot.lane.b32.xlu1 %v2763_v46, %s2628_s14  ;;  %157 = vrot.lane.b32.xlu0 %v2763_v46, %s2629_s15 }
 0x209   :  { %268 = vrot.lane.b32.xlu1 %v2763_v46, %s2630_s16  ;;  %323 = vrot.lane.b32.xlu0 %v2763_v46, %s2631_s17 }
 0x20d   :  { %211 = vrot.lane.b32.xlu1 %v2763_v46, %s2632_s18  ;;  %321 = vrot.lane.b32.xlu0 %v2763_v46, %s2633_s19 }
 0x211   :  { %266 = vrot.lane.b32.xlu1 %v2763_v46, %s2634_s20 }
 0x277   :  { %v214_v47 = vpop.permute.xlu1 %213  ;;  %v158_v48 = vpop.permute.xlu0 %157 }
 0x278   :  { %v164_v49 = vsel %vm159_vm2, %v158_v48, 0  ;;  %v219_v50 = vsel %vm159_vm2, %v214_v47, 0 }
 0x279   :  { %2275 = vmatpush3.bf16.xpose.msra.mxu1 %v164_v49  ;;  %2281 = vmatpush3.bf16.xpose.msra.mxu0 %v219_v50 }
 0x27a   :  { %2286 = vmatprep.subr.bf16.mxu1 %v2626_v14  ;;  %2292 = vmatprep.subr.bf16.mxu0 %v2626_v14 }
 0x27b   :  { %v269_v51 = vpop.permute.xlu1 %268  ;;  %v324_v52 = vpop.permute.xlu0 %323 }
 0x27c   :  { %v274_v54 = vsel %vm159_vm2, %v269_v51, 0  ;;  %v329_v55 = vsel %vm159_vm2, %v324_v52, 0 }
 0x27f   :  { %v212_v53 = vpop.permute.xlu1 %211  ;;  %v322_v56 = vpop.permute.xlu0 %321 }
 0x280   :  { %2277 = vmatmul.mubr.msk.bf16.vlgmr.msra.gmra.mxu1 %vm159_vm2, %v2763_v46  ;;  %2283 = vmatmul.mubr.msk.bf16.vlgmr.msra.gmra.mxu0 %vm159_vm2, %v212_v53 }
 0x281   :  { %2287 = vmatpush3.bf16.xpose.msra.mxu1 %v274_v54  ;;  %2293 = vmatpush3.bf16.xpose.msra.mxu0 %v329_v55 }
 0x282   :  { %2288 = vmatprep.mubr.msk.bf16.mxu1 %vm2627_vm1, %v2626_v14  ;;  %2294 = vmatprep.mubr.msk.bf16.mxu0 %vm2627_vm1, %v2626_v14 }
 0x283   :  { %2298 = vmatprep.subr.bf16.mxu1 %v2626_v14  ;;  %2304 = vmatprep.subr.bf16.mxu0 %v2626_v14  ;;  %v267_v57 = vpop.permute.xlu1 %266 }
 0x288   :  { %2289 = vmatmul.mubr.msk.bf16.vlgmr.msra.gmra.mxu1 %vm159_vm2, %v267_v57  ;;  %2295 = vmatmul.mubr.msk.bf16.vlgmr.msra.gmra.mxu0 %vm159_vm2, %v322_v56 }
 0x289   :  { %2300 = vmatprep.mubr.msk.bf16.mxu1 %vm2627_vm1, %v2626_v14  ;;  %2306 = vmatprep.mubr.msk.bf16.mxu0 %vm2627_vm1, %v2626_v14 }
 0x340   :  { %v200_v58 = vpop.f32.mrf.mxu1  ;;  %v255_v59 = vpop.f32.mrf.mxu0 }
 0x341   :  { %v207_v61 = vmul.f32 0.35355338, %v200_v58  ;;  %v262_v62 = vmul.f32 0.35355338, %v255_v59 }
 0x342   :  { %v2278_v63 = vpop.f32.mrf.mxu1  ;;  %v2284_v2 = vpop.f32.mrf.mxu0 }
 0x343   :  { %v264_v3 = vadd.f32 %v262_v62, %v2803_v60  ;;  %v209_v4 = vadd.f32 %v207_v61, %v2803_v60 }
 0x344   :  { %v203_v5 = vpop.f32.mrf.mxu1  ;;  %v258_v6 = vpop.f32.mrf.mxu0 }
 0x345   :  { %v208_v8 = vmul.f32 0.35355338, %v203_v5  ;;  %v263_v9 = vmul.f32 0.35355338, %v258_v6  ;;  %v383_v10 = vsel %vm376_vm3, %v264_v3, -inf  ;;  %v377_v11 = vsel %vm376_vm3, %v209_v4, -inf }
 0x346   :  { %v2285_v12 = vpop.f32.mrf.mxu0  ;;  %384 = vmax.xlane.f32.xlu0 %v383_v10  ;;  %378 = vmax.xlane.f32.xlu1 %v377_v11  ;;  %v2279_v13 = vpop.f32.mrf.mxu1 }
 0x347   :  { %v210_v15 = vadd.f32 %v208_v8, %v2810_v7  ;;  %v265_v18 = vadd.f32 %v263_v9, %v2810_v7 }
 0x348   :  { %v310_v16 = vpop.f32.mrf.mxu1  ;;  %v365_v17 = vpop.f32.mrf.mxu0 }
 0x349   :  { %v317_v19 = vmul.f32 0.35355338, %v310_v16  ;;  %v372_v20 = vmul.f32 0.35355338, %v365_v17  ;;  %v380_v21 = vsel %vm376_vm3, %v210_v15, -inf  ;;  %v386_v31 = vsel %vm376_vm3, %v265_v18, -inf }
 0x34a   :  { %v2296_v22 = vpop.f32.mrf.mxu0  ;;  %381 = vmax.xlane.f32.xlu0 %v380_v21  ;;  %v2290_v23 = vpop.f32.mrf.mxu1 }
 0x34b   :  { %v319_v27 = vadd.f32 %v317_v19, %v2803_v60  ;;  %v374_v35 = vadd.f32 %v372_v20, %v2803_v60 }
 0x34c   :  { %v313_v28 = vpop.f32.mrf.mxu1  ;;  %v368_v29 = vpop.f32.mrf.mxu0 }
 0x34d   :  { %v318_v32 = vmul.f32 0.35355338, %v313_v28  ;;  %v373_v33 = vmul.f32 0.35355338, %v368_v29  ;;  %v389_v34 = vsel %vm376_vm3, %v319_v27, -inf  ;;  %v395_v39 = vsel %vm376_vm3, %v374_v35, -inf }
 0x34e   :  { %v2297_v36 = vpop.f32.mrf.mxu0  ;;  %387 = vmax.xlane.f32.xlu0 %v386_v31  ;;  %390 = vmax.xlane.f32.xlu1 %v389_v34  ;;  %v2291_v37 = vpop.f32.mrf.mxu1 }
 0x34f   :  { %v320_v38 = vadd.f32 %v318_v32, %v2810_v7  ;;  %v375_v41 = vadd.f32 %v373_v33, %v2810_v7 }
 0x351   :  { %v392_v40 = vsel %vm376_vm3, %v320_v38, -inf  ;;  %v398_v42 = vsel %vm376_vm3, %v375_v41, -inf }
 0x352   :  { %396 = vmax.xlane.f32.xlu1 %v395_v39  ;;  %393 = vmax.xlane.f32.xlu0 %v392_v40 }
 0x356   :  { %399 = vmax.xlane.f32.xlu0 %v398_v42 }
 0x363   :  { %466 = vrot.lane.b32.xlu1 %v2763_v46, %s2635_s0 }
 0x3cf   :  { %v385_v43 = vpop.xlane.xlu0 %384  ;;  %v379_v44 = vpop.xlane.xlu1 %378 }
 0x3d0   :  { %v403_v45 = vsub.f32 %v264_v3, %v385_v43  ;;  %v401_v47 = vsub.f32 %v209_v4, %v379_v44 }
 0x3d2   :  { %v409_v48 = vmul.f32 1.442695, %v401_v47  ;;  %v413_v49 = vmul.f32 1.442695, %v403_v45 }
 0x3d3   :  { %v382_v50 = vpop.xlane.xlu0 %381 }
 0x3d4   :  { %v402_v51 = vsub.f32 %v210_v15, %v382_v50  ;;  %2537 = vpow2.f32 %v409_v48 }
 0x3d5   :  { %2539 = vpow2.f32 %v413_v49 }
 0x3d6   :  { %v411_v52 = vmul.f32 1.442695, %v402_v51 }
 0x3d7   :  { %v388_v53 = vpop.xlane.xlu0 %387  ;;  %v391_v54 = vpop.xlane.xlu1 %390 }
 0x3d8   :  { %2541 = vpow2.f32 %v411_v52  ;;  %v404_v55 = vsub.f32 %v265_v18, %v388_v53  ;;  %v405_v56 = vsub.f32 %v319_v27, %v391_v54 }
 0x3da   :  { %v415_v57 = vmul.f32 1.442695, %v404_v55  ;;  %v417_v58 = vmul.f32 1.442695, %v405_v56 }
 0x3db   :  { %v397_v59 = vpop.xlane.xlu1 %396  ;;  %v394_v61 = vpop.xlane.xlu0 %393 }
 0x3dc   :  { %2543 = vpow2.f32 %v415_v57  ;;  %v407_v62 = vsub.f32 %v374_v35, %v397_v59  ;;  %v406_v63 = vsub.f32 %v320_v38, %v394_v61 }
 0x3dd   :  { %2545 = vpow2.f32 %v417_v58 }
 0x3de   :  { %v421_v2 = vmul.f32 1.442695, %v407_v62  ;;  %v419_v3 = vmul.f32 1.442695, %v406_v63 }
 0x3df   :  { %v467_v4 = vpop.permute.xlu1 %466  ;;  %v400_v5 = vpop.xlane.xlu0 %399 }
 0x3e0   :  { %2547 = vpow2.f32 %v421_v2  ;;  %v408_v6 = vsub.f32 %v375_v41, %v400_v5  ;;  %2299 = vmatpush3.bf16.msra.mxu1 %v467_v4  ;;  %v2501_v4 = vld [vmem:[%s3222_s5 + $0x8] sm:$0xff]  }
 0x3e1   :  { %2549 = vpow2.f32 %v419_v3  ;;  %2310 = vmatprep.subr.bf16.mxu1 %v2626_v14  ;;  %v2538_v8 = vpop.eup %2537 }
 0x3e2   :  { %v423_v9 = vmul.f32 1.442695, %v408_v6  ;;  %v425_v10 = vsel %vm376_vm3, %v2538_v8, 0.0  ;;  %v2540_v11 = vpop.eup %2539 }
 0x3e3   :  { %426 = vadd.xlane.f32.xlu1 %v425_v10  ;;  %v431_v15 = vsel %vm376_vm3, %v2540_v11, 0.0 }
 0x3e4   :  { %2551 = vpow2.f32 %v423_v9  ;;  %v2502_v9 = vld [vmem:[%s3222_s5] sm:$0xff]  }
 0x3e5   :  { %v2542_v12 = vpop.eup %2541 }
 0x3e6   :  { %v428_v13 = vsel %vm376_vm3, %v2542_v12, 0.0 }
 0x3e7   :  { %429 = vadd.xlane.f32.xlu0 %v428_v13  ;;  %432 = vadd.xlane.f32.xlu1 %v431_v15 }
 0x3e9   :  { %v2544_v16 = vpop.eup %2543 }
 0x3ea   :  { %v2546_v17 = vpop.eup %2545  ;;  %v434_v18 = vsel %vm376_vm3, %v2544_v16, 0.0 }
 0x3eb   :  { %v437_v19 = vsel %vm376_vm3, %v2546_v17, 0.0  ;;  %435 = vadd.xlane.f32.xlu0 %v434_v18 }
 0x3ec   :  { %438 = vadd.xlane.f32.xlu1 %v437_v19 }
 0x3ed   :  { %v2548_v20 = vpop.eup %2547 }
 0x3ee   :  { %v2550_v21 = vpop.eup %2549  ;;  %v443_v22 = vsel %vm376_vm3, %v2548_v20, 0.0 }
 0x3ef   :  { %v440_v23 = vsel %vm376_vm3, %v2550_v21, 0.0 }
 0x3f0   :  { %444 = vadd.xlane.f32.xlu1 %v443_v22  ;;  %441 = vadd.xlane.f32.xlu0 %v440_v23 }
 0x3f1   :  { %v2552_v27 = vpop.eup %2551 }
 0x3f2   :  { %v446_v28 = vsel %vm376_vm3, %v2552_v27, 0.0 }
 0x3f4   :  { %447 = vadd.xlane.f32.xlu0 %v446_v28 }
 0x401   :  { %562 = vrot.lane.b32.xlu1 %v2763_v46, %s2636_s25 }
 0x405   :  { %610 = vrot.lane.b32.xlu1 %v2763_v46, %s2637_s26 }
 0x40a   :  { %514 = vrot.lane.b32.xlu0 %v2763_v46, %s2638_s27 }
 0x46c   :  { %v427_v29 = vpop.xlane.xlu1 %426 }
 0x46d   :  { %2553 = vrcp.f32 %v427_v29 }
 0x470   :  { %v430_v31 = vpop.xlane.xlu0 %429  ;;  %v433_v32 = vpop.xlane.xlu1 %432 }
 0x471   :  { %2555 = vrcp.f32 %v430_v31 }
 0x472   :  { %2557 = vrcp.f32 %v433_v32 }
 0x474   :  { %v436_v33 = vpop.xlane.xlu0 %435 }
 0x475   :  { %v439_v34 = vpop.xlane.xlu1 %438  ;;  %2559 = vrcp.f32 %v436_v33 }
 0x476   :  { %2561 = vrcp.f32 %v439_v34 }
 0x479   :  { %v445_v35 = vpop.xlane.xlu1 %444  ;;  %v442_v36 = vpop.xlane.xlu0 %441 }
 0x47a   :  { %2563 = vrcp.f32 %v442_v36  ;;  %v2554_v37 = vpop.eup %2553 }
 0x47b   :  { %2565 = vrcp.f32 %v445_v35  ;;  %v457_v40 = vmul.f32 %v2554_v37, %v2538_v8 }
 0x47d   :  { %v448_v38 = vpop.xlane.xlu0 %447  ;;  %v563_v42 = vpop.permute.xlu1 %562 }
 0x47e   :  { %v2556_v39 = vpop.eup %2555  ;;  %2567 = vrcp.f32 %v448_v38 }
 0x47f   :  { %v458_v46 = vmul.f32 %v2556_v39, %v2542_v12  ;;  %v2558_v41 = vpop.eup %2557 }
 0x480   :  { %v459_v47 = vmul.f32 %v2558_v41, %v2540_v11 }
 0x481   :  { %v515_v43 = vpop.permute.xlu0 %514  ;;  %v465_v44 = vpack.c.bf16 %v458_v46, %v457_v40  ;;  %v611_v51 = vpop.permute.xlu1 %610 }
 0x482   :  { %v2560_v45 = vpop.eup %2559  ;;  %2305 = vmatpush3.bf16.msra.mxu0 %v515_v43 }
 0x483   :  { %2301 = vmatmul.mubr.msk.bf16.vlgmr.msra.gmra.mxu1 %vm376_vm3, %v465_v44  ;;  %2316 = vmatprep.subr.bf16.mxu0 %v2626_v14  ;;  %v460_v48 = vmul.f32 %v2560_v45, %v2544_v16  ;;  %v2562_v50 = vpop.eup %2561 }
 0x484   :  { %2311 = vmatpush3.bf16.msra.mxu1 %v563_v42  ;;  %2312 = vmatprep.mubr.msk.bf16.mxu1 %vm2627_vm1, %v2626_v14  ;;  %v461_v54 = vmul.f32 %v2562_v50, %v2546_v17  ;;  %v753_v42 = vsub.s32 2, %v2740_v24 }
 0x485   :  { %v513_v49 = vpack.c.bf16 %v460_v48, %v459_v47  ;;  %2322 = vmatprep.subr.bf16.mxu1 %v2626_v14 }
 0x486   :  { %v754_v43 = vrot.slane %v2748_v26, %v753_v42 }
 0x487   :  { %2307 = vmatmul.mubr.msk.bf16.vlgmr.msra.gmra.mxu0 %vm376_vm3, %v513_v49  ;;  %v2564_v52 = vpop.eup %2563 }
 0x488   :  { %2317 = vmatpush3.bf16.msra.mxu0 %v611_v51  ;;  %2318 = vmatprep.mubr.msk.bf16.mxu0 %vm2627_vm1, %v2626_v14  ;;  %v2566_v53 = vpop.eup %2565  ;;  %v462_v55 = vmul.f32 %v2564_v52, %v2550_v21 }
 0x489   :  { %2330 = vmatprep.subr.bf16.mxu0 %v2626_v14  ;;  %v463_v58 = vmul.f32 %v2566_v53, %v2548_v20 }
 0x48a   :  { %v561_v57 = vpack.c.bf16 %v462_v55, %v461_v54 }
 0x48b   :  { %v2568_v56 = vpop.eup %2567 }
 0x48c   :  { %v464_v59 = vmul.f32 %v2568_v56, %v2552_v27  ;;  %2313 = vmatmul.mubr.msk.bf16.vlgmr.msra.gmra.mxu1 %vm376_vm3, %v561_v57 }
 0x48d   :  { %2326 = vmatprep.mubr.msk.bf16.mxu1 %vm2627_vm1, %v2626_v14  ;;  %2323 = vmatpush3.bf16.msra.mxu1 %v2501_v4 }
 0x48e   :  { %v609_v61 = vpack.c.bf16 %v464_v59, %v463_v58  ;;  %2324 = vmatprep.subr.bf16.mxu1 %v2626_v14 }
 0x490   :  { %2319 = vmatmul.mubr.msk.bf16.vlgmr.msra.gmra.mxu0 %vm376_vm3, %v609_v61 }
 0x491   :  { %2334 = vmatprep.mubr.msk.bf16.mxu0 %vm2627_vm1, %v2626_v14  ;;  %2325 = vmatpush3.bf16.msra.mxu1 %v2502_v9 }
 0x492   :  { %2338 = vmatprep.subr.bf16.mxu1 %v2626_v14 }
 0x543   :  { %v506_v62 = vpop.f32.mrf.mxu1 }
 0x545   :  { %v2302_v63 = vpop.f32.mrf.mxu1 }
 0x547   :  { %v509_v2 = vpop.f32.mrf.mxu1  ;;  %v554_v3 = vpop.f32.mrf.mxu0 }
 0x549   :  { %v2303_v5 = vpop.f32.mrf.mxu1  ;;  %v2308_v6 = vpop.f32.mrf.mxu0 }
 0x54b   :  { %v557_v8 = vpop.f32.mrf.mxu0 }
 0x54c   :  { %v2467_v10 = vpack.i.bf16 %v557_v8, %v554_v3  ;;  %v602_v11 = vpop.f32.mrf.mxu1  ;;  %v2504_v3 = vld [vmem:[%s3223_s6] sm:$0xff]  }
 0x54d   :  { %v2309_v12 = vpop.f32.mrf.mxu0 }
 0x54e   :  { %2468 = vrot.lane.b32.xlu1 %v2467_v10, %s2639_s21  ;;  %v2314_v13 = vpop.f32.mrf.mxu1 }
 0x550   :  { %v650_v15 = vpop.f32.mrf.mxu0  ;;  %v605_v16 = vpop.f32.mrf.mxu1 }
 0x551   :  { %v2472_v17 = vpack.i.bf16 %v605_v16, %v602_v11  ;;  %v785_v11 = vsub.s32 3, %v2740_v24  ;;  %v791_v16 = vsub.s32 4, %v2740_v24 }
 0x552   :  { %v2320_v18 = vpop.f32.mrf.mxu0  ;;  %v2315_v19 = vpop.f32.mrf.mxu1 }
 0x553   :  { %2473 = vrot.lane.b32.xlu0 %v2472_v17, %s3231_s22 }
 0x554   :  { %v653_v20 = vpop.f32.mrf.mxu0 }
 0x555   :  { %v2477_v21 = vpack.i.bf16 %v653_v20, %v650_v15  ;;  %v786_v15 = vrot.slane %v2748_v26, %v785_v11  ;;  %v792_v20 = vrot.slane %v2748_v26, %v791_v16 }
 0x556   :  { %v2321_v22 = vpop.f32.mrf.mxu0 }
 0x557   :  { %2478 = vrot.lane.b32.xlu1 %v2477_v21, %s3230_s23 }
 0x5c0   :  { %v2469_v23 = vpop.permute.xlu1 %2468 }
 0x5c1   :  { %v2471_v27 = vunpack.i.h.bf16 %v2469_v23  ;;  %v2470_v28 = vunpack.i.l.bf16 %v2469_v23 }
 0x5c3   :  { %v681_v34 = vsel %vm159_vm2, %v506_v62, %v2470_v28  ;;  %v682_v35 = vsel %vm159_vm2, %v509_v2, %v2471_v27  ;;  %v2503_v2 = vld [vmem:[%s3223_s6 + $0x8] sm:$0xff]   ;;  %v2505_v28 = vld [vmem:[%s3224_s8 + $0x38] sm:$0xff]  }
 0x5c4   :  { %2331 = vmatpush3.bf16.msra.mxu0 %v2503_v2 }
 0x5c5   :  { %v2474_v29 = vpop.permute.xlu0 %2473  ;;  %2332 = vmatprep.subr.bf16.mxu0 %v2626_v14 }
 0x5c6   :  { %v2476_v31 = vunpack.i.h.bf16 %v2474_v29  ;;  %v2475_v32 = vunpack.i.l.bf16 %v2474_v29  ;;  %v2506_v29 = vld [vmem:[%s3224_s8 + $0x30] sm:$0xff]  }
 0x5c8   :  { %v684_v38 = vsel %vm376_vm3, %v682_v35, %v2476_v31  ;;  %v683_v39 = vsel %vm376_vm3, %v681_v34, %v2475_v32  ;;  %2333 = vmatpush3.bf16.msra.mxu0 %v2504_v3  ;;  %v2507_v31 = vld [vmem:[%s3224_s8 + $0x28] sm:$0xff]   ;;  %v2508_v32 = vld [vmem:[%s3224_s8 + $0x20] sm:$0xff]   ;;  %v2510_v34 = vld [vmem:[%s3224_s8 + $0x10] sm:$0xff]   ;;  %v991_v3 = vsub.s32 5, %v2740_v24 }
 0x5c9   :  { %v2479_v33 = vpop.permute.xlu1 %2478  ;;  %2358 = vmatprep.subr.bf16.mxu0 %v2626_v14  ;;  %v2511_v35 = vld [vmem:[%s3224_s8 + $0x8] sm:$0xff]  }
 0x5ca   :  { %v2481_v36 = vunpack.i.h.bf16 %v2479_v33  ;;  %v2480_v37 = vunpack.i.l.bf16 %v2479_v33  ;;  %v2509_v33 = vld [vmem:[%s3224_s8 + $0x18] sm:$0xff]  }
 0x5cc   :  { %v686_v40 = vsel %vm685_vm4, %v683_v39, %v2480_v37  ;;  %v687_v46 = vsel %vm685_vm4, %v684_v38, %v2481_v36  ;;  %v2512_v36 = vld [vmem:[%s3224_s8] sm:$0xff]  }
 0x5cd   :  { %v688_v41 = vpack.c.bf16 %v687_v46, %v686_v40  ;;  %v2120_v37 = vld [vmem:[%s3225_s7] ss:$0 sm:$0xff] }
 0x5cf   :  { %2327 = vmatmul.mubr.msk.bf16.vlgmr.msra.gmra.mxu1 %vm47_vm0, %v688_v41 }
 0x5d0   :  { %2354 = vmatprep.mubr.msk.bf16.mxu1 %vm2627_vm1, %v2626_v14  ;;  %2339 = vmatpush3.bf16.msra.mxu1 %v2505_v28 }
 0x5d1   :  { %2340 = vmatprep.subr.bf16.mxu1 %v2626_v14 }
 0x5d4   :  { %2341 = vmatpush3.bf16.msra.mxu1 %v2506_v29  ;;  %v2513_v29 = vld [vmem:[%s3218_s3 + $0x18] sm:$0xff]  }
 0x5d5   :  { %2342 = vmatprep.subr.bf16.mxu1 %v2626_v14 }
 0x5d8   :  { %2343 = vmatpush3.bf16.msra.mxu1 %v2507_v31  ;;  %v2514_v31 = vld [vmem:[%s3218_s3 + $0x10] sm:$0xff]  }
 0x5d9   :  { %2344 = vmatprep.subr.bf16.mxu1 %v2626_v14 }
 0x5dc   :  { %2345 = vmatpush3.bf16.msra.mxu1 %v2508_v32 }
 0x5dd   :  { %2346 = vmatprep.subr.bf16.mxu1 %v2626_v14 }
 0x5e0   :  { %2347 = vmatpush3.bf16.msra.mxu1 %v2509_v33 }
 0x5e1   :  { %2348 = vmatprep.subr.bf16.mxu1 %v2626_v14 }
 0x5e4   :  { %2349 = vmatpush3.bf16.msra.mxu1 %v2510_v34 }
 0x5e5   :  { %2350 = vmatprep.subr.bf16.mxu1 %v2626_v14 }
 0x5e8   :  { %2351 = vmatpush3.bf16.msra.mxu1 %v2511_v35 }
 0x5e9   :  { %2352 = vmatprep.subr.bf16.mxu1 %v2626_v14 }
 0x5ec   :  { %2353 = vmatpush3.bf16.msra.mxu1 %v2512_v36 }
 0x5ed   :  { %2384 = vmatprep.subr.bf16.mxu1 %v2626_v14 }
 0x68f   :  { %v742_v44 = vpop.f32.mrf.mxu1 }
 0x690   :  { %v749_v45 = vadd.f32 %v742_v44, %v2711_v0 }
 0x691   :  { %v2328_v47 = vpop.f32.mrf.mxu1 }
 0x692   :  { %v2883_v48 = vadd.f32 %v754_v43, %v749_v45 }
 0x693   :  { %v745_v49 = vpop.f32.mrf.mxu1 }
 0x694   :  { %v750_v50 = vadd.f32 %v745_v49, %v2716_v1  ;;  %v757_v51 = vsel %vm47_vm0, %v2883_v48, 0.0 }
 0x695   :  { %758 = vadd.xlane.f32.xlu0 %v757_v51  ;;  %v2329_v52 = vpop.f32.mrf.mxu1 }
 0x696   :  { %v2888_v53 = vadd.f32 %v754_v43, %v750_v50 }
 0x698   :  { %v760_v54 = vsel %vm47_vm0, %v2888_v53, 0.0 }
 0x699   :  { %761 = vadd.xlane.f32.xlu1 %v760_v54 }
 0x71e   :  { %v759_v55 = vpop.xlane.xlu0 %758 }
 0x71f   :  { %v763_v56 = vmul.f32 0.03125, %v759_v55 }
 0x721   :  { %v765_v0 = vsub.f32 %v2883_v48, %v763_v56 }
 0x722   :  { %v762_v57 = vpop.xlane.xlu1 %761 }
 0x723   :  { %v764_v58 = vmul.f32 0.03125, %v762_v57  ;;  %v767_v59 = vmul.f32 %v765_v0, %v765_v0 }
 0x725   :  { %v766_v1 = vsub.f32 %v2888_v53, %v764_v58  ;;  %v769_v61 = vsel %vm47_vm0, %v767_v59, 0.0 }
 0x726   :  { %770 = vadd.xlane.f32.xlu0 %v769_v61 }
 0x727   :  { %v768_v62 = vmul.f32 %v766_v1, %v766_v1 }
 0x729   :  { %v772_v63 = vsel %vm47_vm0, %v768_v62, 0.0 }
 0x72a   :  { %773 = vadd.xlane.f32.xlu0 %v772_v63 }
 0x7af   :  { %v771_v4 = vpop.xlane.xlu0 %770 }
 0x7b0   :  { %v775_v5 = vmul.f32 0.03125, %v771_v4  ;;  %v992_v4 = vrot.slane %v2748_v26, %v991_v3 }
 0x7b2   :  { %v777_v6 = vadd.f32 1e-05, %v775_v5 }
 0x7b3   :  { %v774_v8 = vpop.xlane.xlu0 %773 }
 0x7b4   :  { %2569 = vrsqrt.f32 %v777_v6  ;;  %v776_v9 = vmul.f32 0.03125, %v774_v8 }
 0x7b6   :  { %v778_v10 = vadd.f32 1e-05, %v776_v9 }
 0x7b8   :  { %2571 = vrsqrt.f32 %v778_v10 }
 0x7c1   :  { %v2570_v12 = vpop.eup %2569 }
 0x7c2   :  { %v781_v13 = vmul.f32 %v2570_v12, %v765_v0 }
 0x7c4   :  { %v787_v19 = vmul.f32 %v786_v15, %v781_v13 }
 0x7c5   :  { %v2572_v17 = vpop.eup %2571 }
 0x7c6   :  { %v782_v18 = vmul.f32 %v2572_v17, %v766_v1  ;;  %v793_v22 = vadd.f32 %v792_v20, %v787_v19 }
 0x7c8   :  { %v788_v21 = vmul.f32 %v786_v15, %v782_v18 }
 0x7ca   :  { %v794_v23 = vadd.f32 %v792_v20, %v788_v21 }
 0x7cc   :  { %v795_v27 = vpack.c.bf16 %v794_v23, %v793_v22 }
 0x7ce   :  { %2335 = vmatmul.mubr.msk.bf16.vlgmr.msra.gmra.mxu0 %vm47_vm0, %v795_v27 }
 0x7cf   :  { %2362 = vmatprep.mubr.msk.bf16.mxu0 %vm2627_vm1, %v2626_v14  ;;  %2359 = vmatpush3.bf16.msra.mxu0 %v2513_v29 }
 0x7d0   :  { %2360 = vmatprep.subr.bf16.mxu0 %v2626_v14 }
 0x7d3   :  { %2361 = vmatpush3.bf16.msra.mxu0 %v2514_v31 }
 0x7d4   :  { %2366 = vmatprep.subr.bf16.mxu0 %v2626_v14 }
 0x88e   :  { %v856_v38 = vpop.f32.mrf.mxu0 }
 0x88f   :  { %v857_v39 = vadd.f32 %v2120_v37, %v856_v38  ;;  %v2981_v38 = vld [vmem:[%s3219_s2 + $0x8] sm:$0x3f] }
 0x890   :  { %v2336_v40 = vpop.f32.mrf.mxu0 }
 0x891   :  { %v863_v46 = vmul.f32 %v857_v39, %v857_v39 }
 0x892   :  { %v859_v41 = vpop.f32.mrf.mxu0 }
 0x893   :  { %v865_v43 = vmul.f32 %v863_v46, %v857_v39  ;;  %v860_v44 = vadd.f32 %v2120_v37, %v859_v41  ;;  %v1026_v46 = vrot.slane %v2981_v38, %v2743_v25 }
 0x894   :  { %v2337_v45 = vpop.f32.mrf.mxu0 }
 0x895   :  { %v867_v47 = vmul.f32 0.044715, %v865_v43  ;;  %v864_v49 = vmul.f32 %v860_v44, %v860_v44  ;;  %v1032_v45 = vrot.slane %v2981_v38, %v2753_v30 }
 0x897   :  { %v869_v50 = vadd.f32 %v867_v47, %v857_v39  ;;  %v866_v51 = vmul.f32 %v864_v49, %v860_v44 }
 0x899   :  { %v871_v52 = vmul.f32 0.7978846, %v869_v50  ;;  %v868_v54 = vmul.f32 0.044715, %v866_v51 }
 0x89b   :  { %2573 = vtanh.f32 %v871_v52  ;;  %v870_v55 = vadd.f32 %v868_v54, %v860_v44  ;;  %v2138_v54 = vld [vmem:[%s3220_s4 + $0x1] ss:$0 sm:$0xff] }
 0x89d   :  { %v872_v56 = vmul.f32 0.7978846, %v870_v55 }
 0x89f   :  { %2575 = vtanh.f32 %v872_v56 }
 0x8a8   :  { %v2574_v0 = vpop.eup %2573 }
 0x8a9   :  { %v875_v57 = vadd.f32 1.0, %v2574_v0 }
 0x8ab   :  { %v877_v59 = vmul.f32 0.5, %v875_v57 }
 0x8ac   :  { %v2576_v58 = vpop.eup %2575 }
 0x8ad   :  { %v876_v1 = vadd.f32 1.0, %v2576_v58  ;;  %v879_v62 = vmul.f32 %v877_v59, %v857_v39 }
 0x8af   :  { %v878_v61 = vmul.f32 0.5, %v876_v1 }
 0x8b1   :  { %v880_v63 = vmul.f32 %v878_v61, %v860_v44 }
 0x8b3   :  { %v881_v2 = vpack.c.bf16 %v880_v63, %v879_v62 }
 0x8b5   :  { %2355 = vmatmul.mubr.bf16.vlgmr.msra.gmra.mxu1 %v881_v2 }
 0x8b6   :  { %2386 = vmatprep.mubr.msk.bf16.mxu1 %vm2627_vm1, %v2626_v14 }
 0x975   :  { %v980_v5 = vpop.f32.mrf.mxu1 }
 0x976   :  { %v987_v6 = vadd.f32 %v980_v5, %v2883_v48 }
 0x977   :  { %v2356_v8 = vpop.f32.mrf.mxu1 }
 0x978   :  { %v2957_v9 = vadd.f32 %v992_v4, %v987_v6 }
 0x979   :  { %v983_v10 = vpop.f32.mrf.mxu1 }
 0x97a   :  { %v988_v12 = vadd.f32 %v983_v10, %v2888_v53  ;;  %v997_v13 = vsel %vm47_vm0, %v2957_v9, 0.0 }
 0x97b   :  { %998 = vadd.xlane.f32.xlu0 %v997_v13  ;;  %v2357_v15 = vpop.f32.mrf.mxu1 }
 0x97c   :  { %v2962_v17 = vadd.f32 %v992_v4, %v988_v12 }
 0x97e   :  { %v1000_v18 = vsel %vm47_vm0, %v2962_v17, 0.0 }
 0x97f   :  { %1001 = vadd.xlane.f32.xlu1 %v1000_v18 }
 0xa04   :  { %v999_v26 = vpop.xlane.xlu0 %998 }
 0xa05   :  { %v1003_v19 = vmul.f32 0.03125, %v999_v26 }
 0xa07   :  { %v1005_v48 = vsub.f32 %v2957_v9, %v1003_v19 }
 0xa08   :  { %v1002_v20 = vpop.xlane.xlu1 %1001 }
 0xa09   :  { %v1004_v21 = vmul.f32 0.03125, %v1002_v20  ;;  %v1007_v22 = vmul.f32 %v1005_v48, %v1005_v48 }
 0xa0b   :  { %v1006_v53 = vsub.f32 %v2962_v17, %v1004_v21  ;;  %v1009_v23 = vsel %vm47_vm0, %v1007_v22, 0.0 }
 0xa0c   :  { %1010 = vadd.xlane.f32.xlu0 %v1009_v23 }
 0xa0d   :  { %v1008_v27 = vmul.f32 %v1006_v53, %v1006_v53 }
 0xa0f   :  { %v1012_v28 = vsel %vm47_vm0, %v1008_v27, 0.0 }
 0xa10   :  { %1013 = vadd.xlane.f32.xlu1 %v1012_v28 }
 0xa95   :  { %v1011_v32 = vpop.xlane.xlu0 %1010 }
 0xa96   :  { %v1015_v33 = vmul.f32 0.03125, %v1011_v32 }
 0xa98   :  { %v1017_v34 = vadd.f32 1e-05, %v1015_v33 }
 0xa99   :  { %v1014_v35 = vpop.xlane.xlu1 %1013 }
 0xa9a   :  { %2577 = vrsqrt.f32 %v1017_v34  ;;  %v1016_v36 = vmul.f32 0.03125, %v1014_v35 }
 0xa9c   :  { %v1018_v37 = vadd.f32 1e-05, %v1016_v36 }
 0xa9e   :  { %2579 = vrsqrt.f32 %v1018_v37 }
 0xaa7   :  { %v2578_v39 = vpop.eup %2577 }
 0xaa8   :  { %v1021_v40 = vmul.f32 %v2578_v39, %v1005_v48 }
 0xaaa   :  { %v1027_v44 = vmul.f32 %v1026_v46, %v1021_v40 }
 0xaab   :  { %v2580_v41 = vpop.eup %2579 }
 0xaac   :  { %v1022_v43 = vmul.f32 %v2580_v41, %v1006_v53  ;;  %v1033_v49 = vadd.f32 %v1032_v45, %v1027_v44 }
 0xaae   :  { %v1028_v47 = vmul.f32 %v1026_v46, %v1022_v43 }
 0xab0   :  { %v1034_v50 = vadd.f32 %v1032_v45, %v1028_v47 }
 0xab2   :  { %v1035_v51 = vpack.c.bf16 %v1034_v50, %v1033_v49 }
 0xab4   :  { %2363 = vmatmul.mubr.msk.bf16.vlgmr.msra.gmra.mxu0 %vm47_vm0, %v1035_v51 }
 0xab5   :  { %2368 = vmatprep.mubr.msk.bf16.mxu0 %vm2627_vm1, %v2626_v14 }
 0xb74   :  { %v1098_v52 = vpop.f32.mrf.mxu0 }
 0xb75   :  { %v1099_v0 = vadd.f32 %v2138_v54, %v1098_v52 }
 0xb76   :  { %v2364_v55 = vpop.f32.mrf.mxu0 }
 0xb78   :  { %v1101_v56 = vpop.f32.mrf.mxu0 }
 0xb79   :  { %v1102_v57 = vadd.f32 %v2138_v54, %v1101_v56  ;;  %v2625_v54 = vld [vmem:[%s3221_s1] sm:$0xff] }
 0xb7a   :  { %v2365_v58 = vpop.f32.mrf.mxu0 }
 0xb7b   :  { %v2993_v59 = vpack.c.bf16 %v1102_v57, %v1099_v0 }
 0xb7d   :  { %1162 = vrot.lane.b32.xlu1 %v2993_v59, %s2628_s14  ;;  %1107 = vrot.lane.b32.xlu0 %v2993_v59, %s2629_s15 }
 0xb81   :  { %1160 = vrot.lane.b32.xlu1 %v2993_v59, %s2632_s18  ;;  %1272 = vrot.lane.b32.xlu0 %v2993_v59, %s2631_s17  ;;  %s3232_s18 = smov 16  }
 0xb85   :  { %1217 = vrot.lane.b32.xlu1 %v2993_v59, %s2630_s16  ;;  %1270 = vrot.lane.b32.xlu0 %v2993_v59, %s2633_s19 }
 0xb89   :  { %1215 = vrot.lane.b32.xlu1 %v2993_v59, %s2634_s20 }
 0xbef   :  { %v1108_v1 = vpop.permute.xlu0 %1107  ;;  %v1163_v62 = vpop.permute.xlu1 %1162 }
 0xbf0   :  { %v1113_v61 = vsel %vm159_vm2, %v1108_v1, 0  ;;  %v1168_v5 = vsel %vm159_vm2, %v1163_v62, 0 }
 0xbf1   :  { %2367 = vmatpush3.bf16.xpose.msra.mxu0 %v1113_v61 }
 0xbf2   :  { %2372 = vmatprep.subr.bf16.mxu0 %v2626_v14 }
 0xbf3   :  { %v1273_v63 = vpop.permute.xlu0 %1272  ;;  %v1161_v4 = vpop.permute.xlu1 %1160 }
 0xbf4   :  { %v1278_v2 = vsel %vm159_vm2, %v1273_v63, 0 }
 0xbf5   :  { %2385 = vmatpush3.bf16.xpose.msra.mxu1 %v1278_v2 }
 0xbf6   :  { %2396 = vmatprep.subr.bf16.mxu1 %v2626_v14 }
 0xbf7   :  { %v1271_v6 = vpop.permute.xlu0 %1270  ;;  %v1218_v8 = vpop.permute.xlu1 %1217 }
 0xbf8   :  { %2369 = vmatmul.mubr.msk.bf16.vlgmr.msra.gmra.mxu0 %vm159_vm2, %v2993_v59  ;;  %v1223_v10 = vsel %vm159_vm2, %v1218_v8, 0 }
 0xbf9   :  { %2373 = vmatpush3.bf16.xpose.msra.mxu0 %v1168_v5  ;;  %2374 = vmatprep.mubr.msk.bf16.mxu0 %vm2627_vm1, %v2626_v14 }
 0xbfa   :  { %2378 = vmatprep.subr.bf16.mxu0 %v2626_v14 }
 0xbfb   :  { %v1216_v12 = vpop.permute.xlu1 %1215 }
 0xbfc   :  { %2387 = vmatmul.mubr.msk.bf16.vlgmr.msra.gmra.mxu1 %vm159_vm2, %v1271_v6 }
 0xbfd   :  { %2398 = vmatprep.mubr.msk.bf16.mxu1 %vm2627_vm1, %v2626_v14 }
 0xc00   :  { %2375 = vmatmul.mubr.msk.bf16.vlgmr.msra.gmra.mxu0 %vm159_vm2, %v1161_v4 }
 0xc01   :  { %2379 = vmatpush3.bf16.xpose.msra.mxu0 %v1223_v10  ;;  %2380 = vmatprep.mubr.msk.bf16.mxu0 %vm2627_vm1, %v2626_v14 }
 0xc02   :  { %2390 = vmatprep.subr.bf16.mxu0 %v2626_v14 }
 0xc08   :  { %2381 = vmatmul.mubr.msk.bf16.vlgmr.msra.gmra.mxu0 %vm159_vm2, %v1216_v12 }
 0xc09   :  { %2392 = vmatprep.mubr.msk.bf16.mxu0 %vm2627_vm1, %v2626_v14 }
 0xcb8   :  { %v1149_v13 = vpop.f32.mrf.mxu0 }
 0xcb9   :  { %v1156_v15 = vmul.f32 0.35355338, %v1149_v13 }
 0xcba   :  { %v2370_v18 = vpop.f32.mrf.mxu0 }
 0xcbb   :  { %v1158_v26 = vadd.f32 %v1156_v15, %v2803_v60 }
 0xcbc   :  { %v1152_v19 = vpop.f32.mrf.mxu0  ;;  %v1314_v48 = vpop.f32.mrf.mxu1 }
 0xcbd   :  { %v1157_v20 = vmul.f32 0.35355338, %v1152_v19  ;;  %v1325_v21 = vsel %vm376_vm3, %v1158_v26, -inf  ;;  %v1321_v41 = vmul.f32 0.35355338, %v1314_v48 }
 0xcbe   :  { %1326 = vmax.xlane.f32.xlu1 %v1325_v21  ;;  %v2371_v22 = vpop.f32.mrf.mxu0  ;;  %v2388_v53 = vpop.f32.mrf.mxu1 }
 0xcbf   :  { %v1159_v23 = vadd.f32 %v1157_v20, %v2810_v7  ;;  %v1323_v55 = vadd.f32 %v2625_v54, %v1321_v41 }
 0xcc0   :  { %v1204_v27 = vpop.f32.mrf.mxu0  ;;  %v1317_v28 = vpop.f32.mrf.mxu1 }
 0xcc1   :  { %v1211_v29 = vmul.f32 0.35355338, %v1204_v27  ;;  %v1328_v31 = vsel %vm376_vm3, %v1159_v23, -inf  ;;  %v1322_v50 = vmul.f32 0.35355338, %v1317_v28  ;;  %v1343_v58 = vsel %vm376_vm3, %v1323_v55, -inf }
 0xcc2   :  { %1329 = vmax.xlane.f32.xlu0 %v1328_v31  ;;  %v2376_v32 = vpop.f32.mrf.mxu0  ;;  %v2389_v33 = vpop.f32.mrf.mxu1 }
 0xcc3   :  { %v1213_v34 = vadd.f32 %v1211_v29, %v2803_v60 }
 0xcc4   :  { %v1207_v35 = vpop.f32.mrf.mxu0 }
 0xcc5   :  { %v1212_v36 = vmul.f32 0.35355338, %v1207_v35  ;;  %v1331_v37 = vsel %vm376_vm3, %v1213_v34, -inf }
 0xcc6   :  { %1332 = vmax.xlane.f32.xlu0 %v1331_v37  ;;  %v2377_v39 = vpop.f32.mrf.mxu0 }
 0xcc7   :  { %v1214_v40 = vadd.f32 %v1212_v36, %v2810_v7 }
 0xcc8   :  { %v1259_v46 = vpop.f32.mrf.mxu0 }
 0xcc9   :  { %v1266_v43 = vmul.f32 0.35355338, %v1259_v46  ;;  %v1334_v44 = vsel %vm376_vm3, %v1214_v40, -inf }
 0xcca   :  { %1335 = vmax.xlane.f32.xlu0 %v1334_v44  ;;  %v2382_v45 = vpop.f32.mrf.mxu0 }
 0xccb   :  { %v1268_v47 = vadd.f32 %v1266_v43, %v2803_v60  ;;  %v1324_v60 = vadd.f32 %v1322_v50, %v2810_v7 }
 0xccc   :  { %v1262_v49 = vpop.f32.mrf.mxu0 }
 0xccd   :  { %v1267_v51 = vmul.f32 0.35355338, %v1262_v49  ;;  %v1337_v52 = vsel %vm376_vm3, %v1268_v47, -inf  ;;  %v1346_v1 = vsel %vm376_vm3, %v1324_v60, -inf }
 0xcce   :  { %1338 = vmax.xlane.f32.xlu1 %v1337_v52  ;;  %v2383_v56 = vpop.f32.mrf.mxu0 }
 0xccf   :  { %v1269_v0 = vadd.f32 %v1267_v51, %v2810_v7 }
 0xcd1   :  { %v1340_v57 = vsel %vm376_vm3, %v1269_v0, -inf }
 0xcd2   :  { %1341 = vmax.xlane.f32.xlu0 %v1340_v57  ;;  %1344 = vmax.xlane.f32.xlu1 %v1343_v58 }
 0xcd6   :  { %1347 = vmax.xlane.f32.xlu0 %v1346_v1 }
 0xce3   :  { %1414 = vrot.lane.b32.xlu1 %v2993_v59, %s2635_s0 }
 0xd47   :  { %v1327_v61 = vpop.xlane.xlu1 %1326 }
 0xd48   :  { %v1349_v62 = vsub.f32 %v1158_v26, %v1327_v61 }
 0xd4a   :  { %v1357_v63 = vmul.f32 1.442695, %v1349_v62 }
 0xd4b   :  { %v1330_v2 = vpop.xlane.xlu0 %1329 }
 0xd4c   :  { %2581 = vpow2.f32 %v1357_v63  ;;  %v1350_v4 = vsub.f32 %v1159_v23, %v1330_v2 }
 0xd4e   :  { %v1359_v5 = vmul.f32 1.442695, %v1350_v4 }
 0xd4f   :  { %v1333_v6 = vpop.xlane.xlu0 %1332 }
 0xd50   :  { %2583 = vpow2.f32 %v1359_v5  ;;  %v1351_v13 = vsub.f32 %v1213_v34, %v1333_v6 }
 0xd52   :  { %v1361_v22 = vmul.f32 1.442695, %v1351_v13 }
 0xd53   :  { %v1336_v8 = vpop.xlane.xlu0 %1335 }
 0xd54   :  { %v1352_v20 = vsub.f32 %v1214_v40, %v1336_v8 }
 0xd56   :  { %v1363_v29 = vmul.f32 1.442695, %v1352_v20 }
 0xd57   :  { %v1339_v10 = vpop.xlane.xlu1 %1338 }
 0xd58   :  { %v1353_v53 = vsub.f32 %v1268_v47, %v1339_v10 }
 0xd59   :  { %v2582_v7 = vpop.eup %2581 }
 0xd5a   :  { %v1373_v12 = vsel %vm376_vm3, %v2582_v7, 0.0  ;;  %v1365_v33 = vmul.f32 1.442695, %v1353_v53 }
 0xd5b   :  { %v1342_v15 = vpop.xlane.xlu0 %1341  ;;  %1374 = vadd.xlane.f32.xlu1 %v1373_v12  ;;  %v1345_v18 = vpop.xlane.xlu1 %1344 }
 0xd5c   :  { %v1355_v19 = vsub.f32 %v1323_v55, %v1345_v18  ;;  %v1354_v31 = vsub.f32 %v1269_v0, %v1342_v15 }
 0xd5d   :  { %v2584_v48 = vpop.eup %2583 }
 0xd5e   :  { %v1369_v26 = vmul.f32 1.442695, %v1355_v19  ;;  %v1376_v21 = vsel %vm376_vm3, %v2584_v48, 0.0  ;;  %v1367_v34 = vmul.f32 1.442695, %v1354_v31 }
 0xd5f   :  { %v1415_v23 = vpop.permute.xlu1 %1414  ;;  %1377 = vadd.xlane.f32.xlu0 %v1376_v21  ;;  %v1348_v27 = vpop.xlane.xlu0 %1347 }
 0xd60   :  { %v1356_v28 = vsub.f32 %v1324_v60, %v1348_v27  ;;  %2391 = vmatpush3.bf16.msra.mxu0 %v1415_v23  ;;  %2585 = vpow2.f32 %v1369_v26 }
 0xd61   :  { %2402 = vmatprep.subr.bf16.mxu0 %v2626_v14  ;;  %2587 = vpow2.f32 %v1361_v22 }
 0xd62   :  { %v1371_v32 = vmul.f32 1.442695, %v1356_v28  ;;  %v2515_v28 = vld [vmem:[%s3222_s5 + $0x18] sm:$0xff]  }
 0xd64   :  { %2589 = vpow2.f32 %v1371_v32  ;;  %v2516_v32 = vld [vmem:[%s3222_s5 + $0x10] sm:$0xff]   ;;  %s3233_s5 = smov 24  }
 0xd65   :  { %2591 = vpow2.f32 %v1363_v29 }
 0xd66   :  { %2593 = vpow2.f32 %v1365_v33 }
 0xd67   :  { %2595 = vpow2.f32 %v1367_v34 }
 0xd6d   :  { %v3053_v35 = vpop.eup %2585 }
 0xd6e   :  { %v1391_v36 = vsel %vm376_vm3, %v3053_v35, 0.0  ;;  %v2588_v37 = vpop.eup %2587 }
 0xd6f   :  { %1392 = vadd.xlane.f32.xlu1 %v1391_v36  ;;  %v1379_v41 = vsel %vm376_vm3, %v2588_v37, 0.0 }
 0xd71   :  { %v2590_v39 = vpop.eup %2589 }
 0xd72   :  { %v1394_v40 = vsel %vm376_vm3, %v2590_v39, 0.0  ;;  %v2592_v46 = vpop.eup %2591 }
 0xd73   :  { %1395 = vadd.xlane.f32.xlu0 %v1394_v40  ;;  %v2594_v43 = vpop.eup %2593  ;;  %1380 = vadd.xlane.f32.xlu1 %v1379_v41  ;;  %v1382_v44 = vsel %vm376_vm3, %v2592_v46, 0.0 }
 0xd74   :  { %v2596_v45 = vpop.eup %2595  ;;  %v1385_v47 = vsel %vm376_vm3, %v2594_v43, 0.0 }
 0xd75   :  { %v1388_v49 = vsel %vm376_vm3, %v2596_v45, 0.0 }
 0xd77   :  { %1383 = vadd.xlane.f32.xlu0 %v1382_v44  ;;  %1386 = vadd.xlane.f32.xlu1 %v1385_v47 }
 0xd7b   :  { %1389 = vadd.xlane.f32.xlu0 %v1388_v49 }
 0xd88   :  { %1510 = vrot.lane.b32.xlu1 %v2993_v59, %s2636_s25 }
 0xd8c   :  { %1558 = vrot.lane.b32.xlu1 %v2993_v59, %s2637_s26 }
 0xd91   :  { %1462 = vrot.lane.b32.xlu0 %v2993_v59, %s2638_s27 }
 0xde4   :  { %v1375_v50 = vpop.xlane.xlu1 %1374 }
 0xde5   :  { %2597 = vrcp.f32 %v1375_v50 }
 0xde8   :  { %v1378_v51 = vpop.xlane.xlu0 %1377 }
 0xde9   :  { %2599 = vrcp.f32 %v1378_v51 }
 0xdf2   :  { %v2598_v52 = vpop.eup %2597 }
 0xdf3   :  { %v1405_v55 = vmul.f32 %v2598_v52, %v2582_v7 }
 0xdf6   :  { %v2600_v54 = vpop.eup %2599 }
 0xdf7   :  { %v1406_v56 = vmul.f32 %v2600_v54, %v2584_v48 }
 0xdf8   :  { %v1393_v0 = vpop.xlane.xlu1 %1392 }
 0xdf9   :  { %v1413_v57 = vpack.c.bf16 %v1406_v56, %v1405_v55 }
 0xdfb   :  { %2393 = vmatmul.mubr.msk.bf16.vlgmr.msra.gmra.mxu0 %vm376_vm3, %v1413_v57 }
 0xdfc   :  { %v1396_v58 = vpop.xlane.xlu0 %1395  ;;  %2404 = vmatprep.mubr.msk.bf16.mxu0 %vm2627_vm1, %v2626_v14  ;;  %v1381_v60 = vpop.xlane.xlu1 %1380 }
 0xdfd   :  { %2601 = vrcp.f32 %v1381_v60 }
 0xe00   :  { %v1384_v1 = vpop.xlane.xlu0 %1383  ;;  %v1387_v59 = vpop.xlane.xlu1 %1386 }
 0xe01   :  { %2603 = vrcp.f32 %v1384_v1 }
 0xe02   :  { %2605 = vrcp.f32 %v1387_v59 }
 0xe03   :  { %2607 = vrcp.f32 %v1396_v58 }
 0xe04   :  { %v1390_v61 = vpop.xlane.xlu0 %1389  ;;  %v1511_v62 = vpop.permute.xlu1 %1510 }
 0xe05   :  { %2609 = vrcp.f32 %v1390_v61  ;;  %2403 = vmatpush3.bf16.msra.mxu0 %v1511_v62 }
 0xe06   :  { %2611 = vrcp.f32 %v1393_v0  ;;  %2414 = vmatprep.subr.bf16.mxu0 %v2626_v14 }
 0xe08   :  { %v1463_v63 = vpop.permute.xlu0 %1462  ;;  %v1559_v13 = vpop.permute.xlu1 %1558 }
 0xe09   :  { %2397 = vmatpush3.bf16.msra.mxu1 %v1463_v63 }
 0xe0a   :  { %2408 = vmatprep.subr.bf16.mxu1 %v2626_v14  ;;  %v2602_v2 = vpop.eup %2601 }
 0xe0b   :  { %v1407_v5 = vmul.f32 %v2602_v2, %v2588_v37  ;;  %v1702_v2 = vrot.slane %v2981_v38, %v753_v42 }
 0xe0e   :  { %v2604_v4 = vpop.eup %2603 }
 0xe0f   :  { %v1408_v6 = vmul.f32 %v2604_v4, %v2592_v46  ;;  %v2606_v8 = vpop.eup %2605 }
 0xe10   :  { %v2608_v10 = vpop.eup %2607  ;;  %v1409_v15 = vmul.f32 %v2606_v8, %v2594_v43 }
 0xe11   :  { %v1461_v7 = vpack.c.bf16 %v1408_v6, %v1407_v5  ;;  %v1412_v20 = vmul.f32 %v2608_v10, %v2590_v39 }
 0xe12   :  { %v2610_v12 = vpop.eup %2609 }
 0xe13   :  { %2399 = vmatmul.mubr.msk.bf16.vlgmr.msra.gmra.mxu1 %vm376_vm3, %v1461_v7  ;;  %v1410_v18 = vmul.f32 %v2610_v12, %v2596_v45  ;;  %v2612_v19 = vpop.eup %2611 }
 0xe14   :  { %2409 = vmatpush3.bf16.msra.mxu1 %v1559_v13  ;;  %2410 = vmatprep.mubr.msk.bf16.mxu1 %vm2627_vm1, %v2626_v14  ;;  %v1411_v26 = vmul.f32 %v2612_v19, %v3053_v35 }
 0xe15   :  { %v1509_v48 = vpack.c.bf16 %v1410_v18, %v1409_v15  ;;  %2422 = vmatprep.subr.bf16.mxu1 %v2626_v14 }
 0xe16   :  { %v1557_v21 = vpack.c.bf16 %v1412_v20, %v1411_v26 }
 0xe17   :  { %2405 = vmatmul.mubr.msk.bf16.vlgmr.msra.gmra.mxu0 %vm376_vm3, %v1509_v48 }
 0xe18   :  { %2418 = vmatprep.mubr.msk.bf16.mxu0 %vm2627_vm1, %v2626_v14  ;;  %2415 = vmatpush3.bf16.msra.mxu0 %v2515_v28 }
 0xe19   :  { %2416 = vmatprep.subr.bf16.mxu0 %v2626_v14 }
 0xe1b   :  { %2411 = vmatmul.mubr.msk.bf16.vlgmr.msra.gmra.mxu1 %vm376_vm3, %v1557_v21 }
 0xe1c   :  { %2426 = vmatprep.mubr.msk.bf16.mxu1 %vm2627_vm1, %v2626_v14  ;;  %2417 = vmatpush3.bf16.msra.mxu0 %v2516_v32 }
 0xe1d   :  { %2430 = vmatprep.subr.bf16.mxu0 %v2626_v14 }
 0xebb   :  { %v1454_v22 = vpop.f32.mrf.mxu0 }
 0xebd   :  { %v2394_v53 = vpop.f32.mrf.mxu0 }
 0xebf   :  { %v1457_v23 = vpop.f32.mrf.mxu0 }
 0xec1   :  { %v2395_v27 = vpop.f32.mrf.mxu0 }
 0xec2   :  { %v2518_v27 = vld [vmem:[%s3223_s6 + $0x10] sm:$0xff]  }
 0xed3   :  { %v1502_v29 = vpop.f32.mrf.mxu1 }
 0xed5   :  { %v2400_v31 = vpop.f32.mrf.mxu1 }
 0xed7   :  { %v1505_v33 = vpop.f32.mrf.mxu1  ;;  %v1550_v34 = vpop.f32.mrf.mxu0 }
 0xed8   :  { %v2482_v35 = vpack.i.bf16 %v1505_v33, %v1502_v29 }
 0xed9   :  { %v2401_v36 = vpop.f32.mrf.mxu1  ;;  %v2406_v37 = vpop.f32.mrf.mxu0 }
 0xeda   :  { %2483 = vrot.lane.b32.xlu1 %v2482_v35, %s2639_s21  ;;  %v1734_v37 = vrot.slane %v2981_v38, %v785_v11  ;;  %v2520_v11 = vld [vmem:[%s3224_s8 + $0x70] sm:$0xff]  }
 0xedb   :  { %v1553_v39 = vpop.f32.mrf.mxu0  ;;  %v1598_v40 = vpop.f32.mrf.mxu1 }
 0xedc   :  { %v2487_v46 = vpack.i.bf16 %v1553_v39, %v1550_v34 }
 0xedd   :  { %v2407_v41 = vpop.f32.mrf.mxu0  ;;  %v2412_v43 = vpop.f32.mrf.mxu1 }
 0xede   :  { %2488 = vrot.lane.b32.xlu0 %v2487_v46, %s3232_s18  ;;  %v1740_v41 = vrot.slane %v2981_v38, %v791_v16  ;;  %v2521_v16 = vld [vmem:[%s3224_s8 + $0x68] sm:$0xff]  }
 0xedf   :  { %v1601_v44 = vpop.f32.mrf.mxu1 }
 0xee0   :  { %v2492_v45 = vpack.i.bf16 %v1601_v44, %v1598_v40 }
 0xee1   :  { %v2413_v47 = vpop.f32.mrf.mxu1 }
 0xee2   :  { %2493 = vrot.lane.b32.xlu1 %v2492_v45, %s3233_s5 }
 0xf4c   :  { %v2484_v49 = vpop.permute.xlu1 %2483 }
 0xf4d   :  { %v2486_v51 = vunpack.i.h.bf16 %v2484_v49  ;;  %v2485_v52 = vunpack.i.l.bf16 %v2484_v49  ;;  %v2519_v49 = vld [vmem:[%s3224_s8 + $0x78] sm:$0xff]  }
 0xf4f   :  { %v1630_v0 = vsel %vm159_vm2, %v1457_v23, %v2486_v51  ;;  %v1629_v57 = vsel %vm159_vm2, %v1454_v22, %v2485_v52  ;;  %v2517_v23 = vld [vmem:[%s3223_s6 + $0x18] sm:$0xff]   ;;  %v2524_v52 = vld [vmem:[%s3224_s8 + $0x50] sm:$0xff]  }
 0xf50   :  { %v2489_v50 = vpop.permute.xlu0 %2488  ;;  %2423 = vmatpush3.bf16.msra.mxu1 %v2517_v23  ;;  %v2523_v51 = vld [vmem:[%s3224_s8 + $0x58] sm:$0xff]  }
 0xf51   :  { %v2491_v54 = vunpack.i.h.bf16 %v2489_v50  ;;  %v2490_v55 = vunpack.i.l.bf16 %v2489_v50  ;;  %2424 = vmatprep.subr.bf16.mxu1 %v2626_v14  ;;  %v2522_v50 = vld [vmem:[%s3224_s8 + $0x60] sm:$0xff]  }
 0xf53   :  { %v1631_v1 = vsel %vm376_vm3, %v1629_v57, %v2490_v55  ;;  %v1632_v59 = vsel %vm376_vm3, %v1630_v0, %v2491_v54  ;;  %v2525_v54 = vld [vmem:[%s3224_s8 + $0x48] sm:$0xff]   ;;  %v2526_v55 = vld [vmem:[%s3224_s8 + $0x40] sm:$0xff]  }
 0xf54   :  { %v2494_v56 = vpop.permute.xlu1 %2493  ;;  %2425 = vmatpush3.bf16.msra.mxu1 %v2518_v27 }
 0xf55   :  { %v2496_v58 = vunpack.i.h.bf16 %v2494_v56  ;;  %v2495_v60 = vunpack.i.l.bf16 %v2494_v56  ;;  %v2162_v56 = vld [vmem:[%s3225_s7 + $0x1] ss:$0 sm:$0xff] }
 0xf57   :  { %v1634_v61 = vsel %vm685_vm4, %v1632_v59, %v2496_v58  ;;  %v1633_v62 = vsel %vm685_vm4, %v1631_v1, %v2495_v60 }
 0xf58   :  { %v1635_v63 = vpack.c.bf16 %v1634_v61, %v1633_v62 }
 0xf5a   :  { %2419 = vmatmul.mubr.msk.bf16.vlgmr.msra.gmra.mxu0 %vm47_vm0, %v1635_v63 }
 0xf5b   :  { %2446 = vmatprep.mubr.msk.bf16.mxu0 %vm2627_vm1, %v2626_v14  ;;  %2431 = vmatpush3.bf16.msra.mxu0 %v2519_v49 }
 0xf5c   :  { %2432 = vmatprep.subr.bf16.mxu0 %v2626_v14 }
 0xf5f   :  { %2433 = vmatpush3.bf16.msra.mxu0 %v2520_v11 }
 0xf60   :  { %2434 = vmatprep.subr.bf16.mxu0 %v2626_v14 }
 0xf63   :  { %2435 = vmatpush3.bf16.msra.mxu0 %v2521_v16 }
 0xf64   :  { %2436 = vmatprep.subr.bf16.mxu0 %v2626_v14 }
 0xf67   :  { %2437 = vmatpush3.bf16.msra.mxu0 %v2522_v50 }
 0xf68   :  { %2438 = vmatprep.subr.bf16.mxu0 %v2626_v14 }
 0xf6b   :  { %2439 = vmatpush3.bf16.msra.mxu0 %v2523_v51  ;;  %v1946_v51 = vld [vmem:[%s3227_s9] sm:$0x3] }
 0xf6c   :  { %2440 = vmatprep.subr.bf16.mxu0 %v2626_v14 }
 0xf6f   :  { %2441 = vmatpush3.bf16.msra.mxu0 %v2524_v52 }
 0xf70   :  { %2442 = vmatprep.subr.bf16.mxu0 %v2626_v14 }
 0xf73   :  { %2443 = vmatpush3.bf16.msra.mxu0 %v2525_v54 }
 0xf74   :  { %2444 = vmatprep.subr.bf16.mxu0 %v2626_v14 }
 0xf77   :  { %2445 = vmatpush3.bf16.msra.mxu0 %v2526_v55  ;;  %v1976_v55 = vrot.slane %v1946_v51, %v2743_v25 }
0x101a   :  { %v1690_v4 = vpop.f32.mrf.mxu0 }
0x101b   :  { %v1697_v5 = vadd.f32 %v1690_v4, %v2957_v9 }
0x101c   :  { %v2420_v6 = vpop.f32.mrf.mxu0 }
0x101d   :  { %v3108_v8 = vadd.f32 %v1702_v2, %v1697_v5 }
0x101e   :  { %v1693_v10 = vpop.f32.mrf.mxu0 }
0x101f   :  { %v1698_v7 = vadd.f32 %v1693_v10, %v2962_v17  ;;  %v1705_v12 = vsel %vm47_vm0, %v3108_v8, 0.0 }
0x1020   :  { %1706 = vadd.xlane.f32.xlu0 %v1705_v12  ;;  %v2421_v13 = vpop.f32.mrf.mxu0 }
0x1021   :  { %v3113_v15 = vadd.f32 %v1702_v2, %v1698_v7 }
0x1023   :  { %v1708_v18 = vsel %vm47_vm0, %v3113_v15, 0.0 }
0x1024   :  { %1709 = vadd.xlane.f32.xlu1 %v1708_v18 }
0x10a9   :  { %v1707_v42 = vpop.xlane.xlu0 %1706 }
0x10aa   :  { %v1711_v19 = vmul.f32 0.03125, %v1707_v42 }
0x10ac   :  { %v1713_v9 = vsub.f32 %v3108_v8, %v1711_v19 }
0x10ad   :  { %v1710_v48 = vpop.xlane.xlu1 %1709 }
0x10ae   :  { %v1712_v20 = vmul.f32 0.03125, %v1710_v48  ;;  %v1715_v26 = vmul.f32 %v1713_v9, %v1713_v9 }
0x10b0   :  { %v1714_v17 = vsub.f32 %v3113_v15, %v1712_v20  ;;  %v1717_v21 = vsel %vm47_vm0, %v1715_v26, 0.0 }
0x10b1   :  { %1718 = vadd.xlane.f32.xlu0 %v1717_v21 }
0x10b2   :  { %v1716_v22 = vmul.f32 %v1714_v17, %v1714_v17 }
0x10b4   :  { %v1720_v53 = vsel %vm47_vm0, %v1716_v22, 0.0 }
0x10b5   :  { %1721 = vadd.xlane.f32.xlu0 %v1720_v53 }
0x113a   :  { %v1719_v28 = vpop.xlane.xlu0 %1718 }
0x113b   :  { %v1723_v29 = vmul.f32 0.03125, %v1719_v28 }
0x113d   :  { %v1725_v31 = vadd.f32 1e-05, %v1723_v29 }
0x113e   :  { %v1722_v32 = vpop.xlane.xlu0 %1721 }
0x113f   :  { %2613 = vrsqrt.f32 %v1725_v31  ;;  %v1724_v33 = vmul.f32 0.03125, %v1722_v32 }
0x1141   :  { %v1726_v34 = vadd.f32 1e-05, %v1724_v33 }
0x1143   :  { %2615 = vrsqrt.f32 %v1726_v34 }
0x114c   :  { %v2614_v35 = vpop.eup %2613 }
0x114d   :  { %v1729_v36 = vmul.f32 %v2614_v35, %v1713_v9 }
0x114f   :  { %v1735_v46 = vmul.f32 %v1734_v37, %v1729_v36 }
0x1150   :  { %v2616_v39 = vpop.eup %2615 }
0x1151   :  { %v1730_v40 = vmul.f32 %v2616_v39, %v1714_v17  ;;  %v1741_v44 = vadd.f32 %v1740_v41, %v1735_v46  ;;  %v1943_v17 = vrot.slane %v2981_v38, %v991_v3  ;;  %v2527_v46 = vld [vmem:[%s3226_s10 + $0x10] ss:$8 sps:$4 sm:$0xff]  }
0x1153   :  { %v1736_v43 = vmul.f32 %v1734_v37, %v1730_v40  ;;  %v2529_v40 = vld [vmem:[%s3226_s10 + $0x14] ss:$8 sps:$4 sm:$0xff]  }
0x1154   :  { %2025 = vmatprep.subr.bf16.mxu1 %v2529_v40 }
0x1155   :  { %v1742_v45 = vadd.f32 %v1740_v41, %v1736_v43  ;;  %v2532_v41 = vld [vmem:[%s3226_s10 + $0x4] ss:$8 sps:$4 sm:$0xff]   ;;  %v2642_v43 = vmov 0  }
0x1156   :  { %2497 = vset.pattern.permute.xlu0 %v2642_v43  ;;  %2498 = vset.pattern.permute.xlu1 %v2642_v43 }
0x1157   :  { %v1743_v47 = vpack.c.bf16 %v1742_v45, %v1741_v44  ;;  %v2530_v44 = vld [vmem:[%s3226_s10] ss:$8 sps:$4 sm:$0xff]  }
0x1159   :  { %2427 = vmatmul.mubr.msk.bf16.vlgmr.msra.gmra.mxu1 %vm47_vm0, %v1743_v47 }
0x115a   :  { %2045 = vmatprep.mubr.bf16.mxu1 %v2642_v43  ;;  %2026 = vmatpush1.bf16.msra.mxu1 %v2527_v46 }
0x115b   :  { %2027 = vmatprep.subr.bf16.mxu1 %v2532_v41 }
0x115e   :  { %2028 = vmatpush1.bf16.msra.mxu1 %v2530_v44 }
0x1219   :  { %v1806_v0 = vpop.f32.mrf.mxu1 }
0x121a   :  { %v1807_v57 = vadd.f32 %v2162_v56, %v1806_v0 }
0x121b   :  { %v2428_v58 = vpop.f32.mrf.mxu1 }
0x121c   :  { %v1813_v60 = vmul.f32 %v1807_v57, %v1807_v57  ;;  %v1982_v58 = vrot.slane %v1946_v51, %v2753_v30  ;;  %v2196_v30 = vld [vmem:[%s3228_s11 + $0x1] ss:$0 sm:$0xff] }
0x121d   :  { %v1809_v1 = vpop.f32.mrf.mxu1 }
0x121e   :  { %v1815_v59 = vmul.f32 %v1813_v60, %v1807_v57  ;;  %v1810_v61 = vadd.f32 %v2162_v56, %v1809_v1 }
0x121f   :  { %v2429_v62 = vpop.f32.mrf.mxu1 }
0x1220   :  { %v1817_v63 = vmul.f32 0.044715, %v1815_v59  ;;  %v1814_v2 = vmul.f32 %v1810_v61, %v1810_v61 }
0x1222   :  { %v1819_v14 = vadd.f32 %v1817_v63, %v1807_v57  ;;  %v1816_v4 = vmul.f32 %v1814_v2, %v1810_v61  ;;  %v2195_v63 = vld [vmem:[%s3228_s11] ss:$0 sm:$0xff] }
0x1224   :  { %v1821_v5 = vmul.f32 0.7978846, %v1819_v14  ;;  %v1818_v6 = vmul.f32 0.044715, %v1816_v4 }
0x1226   :  { %2617 = vtanh.f32 %v1821_v5  ;;  %v1820_v10 = vadd.f32 %v1818_v6, %v1810_v61 }
0x1228   :  { %v1822_v7 = vmul.f32 0.7978846, %v1820_v10 }
0x122a   :  { %2619 = vtanh.f32 %v1822_v7 }
0x1233   :  { %v2618_v12 = vpop.eup %2617 }
0x1234   :  { %v1825_v13 = vadd.f32 1.0, %v2618_v12 }
0x1236   :  { %v1827_v42 = vmul.f32 0.5, %v1825_v13 }
0x1237   :  { %v2620_v18 = vpop.eup %2619 }
0x1238   :  { %v1826_v19 = vadd.f32 1.0, %v2620_v18  ;;  %v1829_v48 = vmul.f32 %v1827_v42, %v1807_v57  ;;  %v2197_v42 = vld [vmem:[%s3228_s11 + $0x2] ss:$0 sm:$0xff] }
0x123a   :  { %v1828_v9 = vmul.f32 0.5, %v1826_v19 }
0x123c   :  { %v1830_v20 = vmul.f32 %v1828_v9, %v1810_v61 }
0x123e   :  { %v1831_v26 = vpack.c.bf16 %v1830_v20, %v1829_v48 }
0x1240   :  { %2447 = vmatmul.mubr.bf16.vlgmr.msra.gmra.mxu0 %v1831_v26 }
0x1300   :  { %v1931_v21 = vpop.f32.mrf.mxu0 }
0x1301   :  { %v1938_v22 = vadd.f32 %v1931_v21, %v3108_v8 }
0x1302   :  { %v2448_v53 = vpop.f32.mrf.mxu0 }
0x1303   :  { %v1944_v23 = vadd.f32 %v1943_v17, %v1938_v22 }
0x1304   :  { %v1934_v27 = vpop.f32.mrf.mxu0 }
0x1305   :  { %v1939_v28 = vadd.f32 %v1934_v27, %v3113_v15  ;;  %v1947_v29 = vsel %vm47_vm0, %v1944_v23, 0.0 }
0x1306   :  { %1948 = vadd.xlane.f32.xlu0 %v1947_v29  ;;  %v2449_v31 = vpop.f32.mrf.mxu0 }
0x1307   :  { %v1945_v32 = vadd.f32 %v1943_v17, %v1939_v28 }
0x1309   :  { %v1950_v33 = vsel %vm47_vm0, %v1945_v32, 0.0 }
0x130a   :  { %1951 = vadd.xlane.f32.xlu1 %v1950_v33 }
0x138f   :  { %v1949_v34 = vpop.xlane.xlu0 %1948 }
0x1390   :  { %v1953_v24 = vmul.f32 0.03125, %v1949_v34 }
0x1392   :  { %v1955_v35 = vsub.f32 %v1944_v23, %v1953_v24 }
0x1393   :  { %v1952_v3 = vpop.xlane.xlu1 %1951 }
0x1394   :  { %v1954_v38 = vmul.f32 0.03125, %v1952_v3  ;;  %v1957_v36 = vmul.f32 %v1955_v35, %v1955_v35 }
0x1396   :  { %v1956_v8 = vsub.f32 %v1945_v32, %v1954_v38  ;;  %v1959_v37 = vsel %vm47_vm0, %v1957_v36, 0.0 }
0x1397   :  { %1960 = vadd.xlane.f32.xlu0 %v1959_v37 }
0x1398   :  { %v1958_v39 = vmul.f32 %v1956_v8, %v1956_v8 }
0x139a   :  { %v1962_v15 = vsel %vm47_vm0, %v1958_v39, 0.0 }
0x139b   :  { %1963 = vadd.xlane.f32.xlu1 %v1962_v15 }
0x1420   :  { %v1961_v45 = vpop.xlane.xlu0 %1960 }
0x1421   :  { %v1965_v47 = vmul.f32 0.03125, %v1961_v45 }
0x1423   :  { %v1967_v49 = vadd.f32 1e-05, %v1965_v47 }
0x1424   :  { %v1964_v11 = vpop.xlane.xlu1 %1963 }
0x1425   :  { %2621 = vrsqrt.f32 %v1967_v49  ;;  %v1966_v16 = vmul.f32 0.03125, %v1964_v11 }
0x1427   :  { %v1968_v50 = vadd.f32 1e-05, %v1966_v16 }
0x1429   :  { %2623 = vrsqrt.f32 %v1968_v50 }
0x1432   :  { %v2622_v52 = vpop.eup %2621 }
0x1433   :  { %v1971_v54 = vmul.f32 %v2622_v52, %v1955_v35 }
0x1435   :  { %v1977_v57 = vmul.f32 %v1976_v55, %v1971_v54 }
0x1436   :  { %v2624_v56 = vpop.eup %2623 }
0x1437   :  { %v1972_v0 = vmul.f32 %v2624_v56, %v1956_v8  ;;  %v1983_v1 = vadd.f32 %v1982_v58, %v1977_v57 }
0x1439   :  { %v1978_v60 = vmul.f32 %v1976_v55, %v1972_v0 }
0x143b   :  { %v1984_v59 = vadd.f32 %v1982_v58, %v1978_v60 }
0x143d   :  { %v1985_v61 = vpack.c.bf16 %v1984_v59, %v1983_v1 }
0x143f   :  { %2194 = vmatmul.mubr.msk.bf16.vlgmr.msra.gmra.mxu1 %vm47_vm0, %v1985_v61 }
0x14ff   :  { %v2047_v62 = vpop.f32.mrf.mxu1 }
0x1500   :  { %2056 = vst [vmem:[%s3229_s12] sm:$0xff] %v2047_v62 }
0x1501   :  { %v2049_v25 = vpop.f32.mrf.mxu1 }
0x1502   :  { %v2063_v2 = vadd.f32 %v2195_v63, %v2049_v25 }
0x1503   :  { %v2051_v14 = vpop.f32.mrf.mxu1 }
0x1504   :  { %v2067_v4 = vmul.f32 0.01, %v2063_v2  ;;  %2057 = vst [vmem:[%s3229_s12 + $0x10] sm:$0xff] %v2051_v14  ;;  %vm2065_vm5 = vcmp.gt.f32.partialorder %v2063_v2, 0.0 }
0x1505   :  { %v2053_v5 = vpop.f32.mrf.mxu1 }
0x1506   :  { %v2064_v6 = vadd.f32 %v2195_v63, %v2053_v5  ;;  %v2069_v10 = vsel %vm2065_vm5, %v2063_v2, %v2067_v4 }
0x1507   :  { %v2076_v7 = vmul.f32 %v2196_v30, %v2069_v10 }
0x1508   :  { %v2068_v12 = vmul.f32 0.01, %v2064_v6  ;;  %vm2066_vm6 = vcmp.gt.f32.partialorder %v2064_v6, 0.0 }
0x1509   :  { %2078 = vadd.xlane.f32.xlu0 %v2076_v7 }
0x150a   :  { %v2070_v13 = vsel %vm2066_vm6, %v2064_v6, %v2068_v12 }
0x150b   :  { %v2077_v18 = vmul.f32 %v2196_v30, %v2070_v13 }
0x150d   :  { %2080 = vadd.xlane.f32.xlu1 %v2077_v18 }
0x1592   :  { %v2079_v19 = vpop.xlane.xlu0 %2078 }
0x1593   :  { %v2087_v9 = vadd.f32 %v2197_v42, %v2079_v19 }
0x1595   :  { %2091 = vperm.xlu0 %2497, %v2087_v9  }
0x1596   :  { %v2081_v48 = vpop.xlane.xlu1 %2080 }
0x1597   :  { %v2088_v20 = vadd.f32 %v2197_v42, %v2081_v48 }
0x1599   :  { %2096 = vperm.xlu1 %2498, %v2088_v20  }
0x1610   :  { %v2092_v26 = vpop.permute.xlu0 %2091 }
0x1611   :  { %2099 = vst [vmem:[%s3229_s12 + $0x8] sm:$0xff] %v2092_v26 }
0x1614   :  { %v2097_v17 = vpop.permute.xlu1 %2096 }
0x1615   :  { %2100 = vst [vmem:[%s3229_s12 + $0x18] sm:$0xff] %v2097_v17 }

</bundles_post_ra>
